<compile_context>
chip_gen: v7x
topology: tpu7x:2x2x1
jax: 0.10.0
libtpu: 0.0.40
codegen_flags: <defaults>
</compile_context>

<pallas_src>
import jax
import jax.numpy as jnp
from jax.experimental import pallas as pl
from jax.experimental.pallas import tpu as pltpu


# ----------------------------------------------------------------------------
# Pallas kernel (single invocation, no grid; recurrence fully unrolled)
# ----------------------------------------------------------------------------
def _gru_critic_kernel(x_ref, wa_ref, wx0_ref, whx_ref, gb_ref,
                       hw1_ref, hb1_ref, hw2_ref, hb2_ref,
                       hw3_ref, hb3_ref, hw4_ref, hb4_ref,
                       hw5_ref, hb5_ref, out_ref):
    SB, _ = x_ref.shape
    Bp = wa_ref.shape[0]
    S = SB // Bp
    G = gb_ref.shape[-1]               # 4 * H  (fused gate width, lane-dense)
    H = G // 4

    def leaky(v):
        return jnp.where(v > 0, v, 0.01 * v)

    def gates(g, h):
        # gate layout: [r | z | n_x(+bih_n) | n_h(+bhh_n)]
        rz = jax.nn.sigmoid(g[:, 0:2 * H])          # fused r|z EUP push
        r = rz[:, 0:H]
        z = rz[:, H:2 * H]
        n = jnp.tanh(g[:, 2 * H:3 * H] + r * g[:, 3 * H:4 * H])
        return (1.0 - z) * n + z * h

    # GRU weights stay resident in vregs across the unrolled recurrence.
    gw = whx_ref[...]                                # [3, H, 4H]
    wh0, wx1, wh1 = gw[0], gw[1], gw[2]
    gb = gb_ref[...]                                 # [2, 1, 4H]
    b1 = jnp.broadcast_to(gb[1], (Bp, G))            # hoisted broadcast

    # Hoisted layer-0 input projection: all S steps in one MXU pass,
    # layer-0 biases folded in.
    xg = jnp.dot(x_ref[...], wx0_ref[...], preferred_element_type=jnp.float32)
    xg = (xg + gb[0]).reshape(S, Bp, G)

    h1 = jnp.zeros((Bp, H), jnp.float32)
    h2 = jnp.zeros((Bp, H), jnp.float32)
    for t in range(S):                               # S is small & static
        g0 = xg[t] + jnp.dot(h1, wh0, preferred_element_type=jnp.float32)
        h1 = gates(g0, h1)
        g1 = (jnp.dot(h1, wx1, preferred_element_type=jnp.float32)
              + jnp.dot(h2, wh1, preferred_element_type=jnp.float32) + b1)
        h2 = gates(g1, h2)

    # ---- MLP head: fc1 split to avoid the [h2 | w | action] concat ----------
    w1_h = hw1_ref[pl.ds(0, H), :]                   # rows for leaky(h2)
    w1_wa = hw1_ref[pl.ds(H, 2 * H), :]              # rows for [w | action]
    y = (jnp.dot(leaky(h2), w1_h, preferred_element_type=jnp.float32)
         + jnp.dot(wa_ref[...], w1_wa, preferred_element_type=jnp.float32)
         + hb1_ref[...])
    y = leaky(y)
    y = leaky(jnp.dot(y, hw2_ref[...], preferred_element_type=jnp.float32)
              + hb2_ref[...])
    y = leaky(jnp.dot(y, hw3_ref[...], preferred_element_type=jnp.float32)
              + hb3_ref[...])
    y = leaky(jnp.dot(y, hw4_ref[...], preferred_element_type=jnp.float32)
              + hb4_ref[...])
    out_ref[...] = (jnp.dot(y, hw5_ref[...], preferred_element_type=jnp.float32)
                    + hb5_ref[...]).astype(out_ref.dtype)


# ----------------------------------------------------------------------------
# Wrapper
# ----------------------------------------------------------------------------
def _round_up(v, m):
    return ((v + m - 1) // m) * m


@jax.jit
def gru_critic_forward(x, w, action, params):
    # Mirror the PyTorch 3-D (unbatched) handling.
    if x.ndim == 3:
        x = x[None, :, :, :]
        w = w[None, :]
        action = action[None, :]

    B, S = x.shape[0], x.shape[1]
    x_flat = x.reshape(B, S, -1).astype(jnp.float32)        # flatten(2)
    IN = x_flat.shape[-1]
    H = params["whh0"].shape[1]
    G = 4 * H
    Bp = _round_up(max(B, 8), 8)                             # sublane quantum

    # time-major, batch-padded x, flattened to [S*Bp, IN] for the hoisted
    # layer-0 projection (single batched matmul inside the kernel).
    x_tm = jnp.transpose(x_flat, (1, 0, 2))                  # [S, B, IN]
    x_tm = jnp.pad(x_tm, ((0, 0), (0, Bp - B), (0, 0))).reshape(S * Bp, IN)

    # [w | action]; consumed via the split fc1 matmul (no in-kernel concat).
    wa = jnp.zeros((Bp, 2 * H), jnp.float32)
    wa = wa.at[:B, 0:H].set(w.astype(jnp.float32))
    wa = wa.at[:B, H:2 * H].set(action.astype(jnp.float32))

    # --- split-K fused GRU weights: gate layout [r | z | n_x(+bih_n) | n_h(+bhh_n)]
    def split_fuse(wih, whh, bih, bhh):
        Wx = wih.T.astype(jnp.float32)                       # [in, 3H]
        Wh = whh.T.astype(jnp.float32)                       # [H,  3H]
        wx = jnp.concatenate(
            [Wx, jnp.zeros((Wx.shape[0], H), jnp.float32)], axis=1)   # [in, 4H]
        wh = jnp.concatenate(
            [Wh[:, 0:2 * H], jnp.zeros((H, H), jnp.float32),
             Wh[:, 2 * H:3 * H]], axis=1)                              # [H, 4H]
        b = jnp.concatenate(
            [bih[0:H] + bhh[0:H], bih[H:2 * H] + bhh[H:2 * H],
             bih[2 * H:3 * H], bhh[2 * H:3 * H]]).astype(jnp.float32)  # [4H]
        return wx, wh, b

    wx0, wh0, b0 = split_fuse(params["wih0"], params["whh0"],
                              params["bih0"], params["bhh0"])
    wx1, wh1, b1 = split_fuse(params["wih1"], params["whh1"],
                              params["bih1"], params["bhh1"])
    whx = jnp.stack([wh0, wx1, wh1])                         # [3, H, 4H]
    gb = jnp.stack([b0, b1]).reshape(2, 1, G)                # [2, 1, 4H]

    # --- MLP head at natural (transposed) shapes; only the last layer /
    # output tile is padded out to a lane-dense 128-wide slab.
    f32 = jnp.float32
    hw1 = params["w1"].T.astype(f32)                         # [3H, 128]
    hb1 = params["b1"].astype(f32).reshape(1, -1)
    hw2 = params["w2"].T.astype(f32)                         # [128, 64]
    hb2 = params["b2"].astype(f32).reshape(1, -1)
    hw3 = params["w3"].T.astype(f32)                         # [64, 32]
    hb3 = params["b3"].astype(f32).reshape(1, -1)
    hw4 = params["w4"].T.astype(f32)                         # [32, 16]
    hb4 = params["b4"].astype(f32).reshape(1, -1)
    hw5 = jnp.zeros((hw4.shape[1], 128), f32).at[:, 0:1].set(
        params["w5"].T.astype(f32))                          # [16, 128]
    hb5 = jnp.zeros((1, 128), f32).at[0, 0].set(params["b5"].astype(f32)[0])

    args = (x_tm, wa, wx0, whx, gb,
            hw1, hb1, hw2, hb2, hw3, hb3, hw4, hb4, hw5, hb5)
    out = pl.pallas_call(
        _gru_critic_kernel,
        out_shape=jax.ShapeDtypeStruct((Bp, 128), jnp.float32),
        in_specs=[pl.BlockSpec(memory_space=pltpu.MemorySpace.VMEM)] * len(args),
        out_specs=pl.BlockSpec(memory_space=pltpu.MemorySpace.VMEM),
    )(*args)
    return out[:B, 0:1]


# ----------------------------------------------------------------------------
# Deterministic parameter init (shapes from GRUCritic.__init__)
# ----------------------------------------------------------------------------
def init_params(key, input_size, output_size):
    H = output_size
    keys = jax.random.split(key, 18)
    ki = iter(keys)

    def uni(k, shape, bound):
        return jax.random.uniform(k, shape, jnp.float32, -bound, bound)

    kg = 1.0 / jnp.sqrt(H)
    params = {
        "wih0": uni(next(ki), (3 * H, input_size), kg),
        "whh0": uni(next(ki), (3 * H, H), kg),
        "bih0": uni(next(ki), (3 * H,), kg),
        "bhh0": uni(next(ki), (3 * H,), kg),
        "wih1": uni(next(ki), (3 * H, H), kg),
        "whh1": uni(next(ki), (3 * H, H), kg),
        "bih1": uni(next(ki), (3 * H,), kg),
        "bhh1": uni(next(ki), (3 * H,), kg),
    }
    fc_dims = [(3 * H, 128), (128, 64), (64, 32), (32, 16), (16, 1)]
    for n, (fi, fo) in enumerate(fc_dims, start=1):
        kb = 1.0 / jnp.sqrt(fi)
        params[f"w{n}"] = uni(next(ki), (fo, fi), kb)
        params[f"b{n}"] = uni(next(ki), (fo,), kb)
    return params


# ----------------------------------------------------------------------------
# Pure-JAX reference (for correctness check)
# ----------------------------------------------------------------------------
def reference_forward(x, w, action, params):
    if x.ndim == 3:
        x = x[None]
        w = w[None]
        action = action[None]
    B, S = x.shape[0], x.shape[1]
    xf = x.reshape(B, S, -1)
    H = params["whh0"].shape[1]

    def leaky(v):
        return jnp.where(v > 0, v, 0.01 * v)

    def cell(xt, h, wih, whh, bih, bhh):
        gi = xt @ wih.T + bih
        gh = h @ whh.T + bhh
        r = jax.nn.sigmoid(gi[:, :H] + gh[:, :H])
        z = jax.nn.sigmoid(gi[:, H:2 * H] + gh[:, H:2 * H])
        n = jnp.tanh(gi[:, 2 * H:] + r * gh[:, 2 * H:])
        return (1.0 - z) * n + z * h

    h1 = jnp.zeros((B, H), jnp.float32)
    h2 = jnp.zeros((B, H), jnp.float32)
    for t in range(S):
        h1 = cell(xf[:, t], h1, params["wih0"], params["whh0"],
                  params["bih0"], params["bhh0"])
        h2 = cell(h1, h2, params["wih1"], params["whh1"],
                  params["bih1"], params["bhh1"])

    y = jnp.concatenate([leaky(h2), w, action], axis=-1)
    y = leaky(y @ params["w1"].T + params["b1"])
    y = leaky(y @ params["w2"].T + params["b2"])
    y = leaky(y @ params["w3"].T + params["b3"])
    y = leaky(y @ params["w4"].T + params["b4"])
    y = y @ params["w5"].T + params["b5"]
    return y


# ----------------------------------------------------------------------------
if __name__ == "__main__":
    # x [B, S, A, F] -> flatten(2) gives input_size = A*F; w/action [B, H].
    B, S, A, F = 2, 8, 4, 4
    input_size = A * F      # 16
    output_size = 32        # GRU hidden size

    key = jax.random.PRNGKey(0)
    kx, kw, ka, kp = jax.random.split(key, 4)
    x = jax.random.normal(kx, (B, S, A, F), jnp.float32)
    w = jax.random.normal(kw, (B, output_size), jnp.float32)
    action = jax.random.normal(ka, (B, output_size), jnp.float32)
    params = init_params(kp, input_size, output_size)

    out = gru_critic_forward(x, w, action, params)
    out = jax.block_until_ready(out)

    ref = reference_forward(x, w, action, params)
    assert out.shape == (B, 1), out.shape
    assert jnp.allclose(out, ref, atol=1e-4, rtol=1e-4), (out, ref)

    print("KERNEL_OK")
</pallas_src>

<mosaic_0001>
module attributes {stable_mosaic.version = 11 : i64} {
  func.func @_gru_critic_kernel(%arg0: memref<64x16xf32, #tpu.memory_space<vmem>>, %arg1: memref<8x64xf32, #tpu.memory_space<vmem>>, %arg2: memref<16x128xf32, #tpu.memory_space<vmem>>, %arg3: memref<3x32x128xf32, #tpu.memory_space<vmem>>, %arg4: memref<2x1x128xf32, #tpu.memory_space<vmem>>, %arg5: memref<96x128xf32, #tpu.memory_space<vmem>>, %arg6: memref<1x128xf32, #tpu.memory_space<vmem>>, %arg7: memref<128x64xf32, #tpu.memory_space<vmem>>, %arg8: memref<1x64xf32, #tpu.memory_space<vmem>>, %arg9: memref<64x32xf32, #tpu.memory_space<vmem>>, %arg10: memref<1x32xf32, #tpu.memory_space<vmem>>, %arg11: memref<32x16xf32, #tpu.memory_space<vmem>>, %arg12: memref<1x16xf32, #tpu.memory_space<vmem>>, %arg13: memref<16x128xf32, #tpu.memory_space<vmem>>, %arg14: memref<1x128xf32, #tpu.memory_space<vmem>>, %arg15: memref<8x128xf32, #tpu.memory_space<vmem>>) attributes {dimension_semantics = [], scalar_prefetch = 0 : i64, scratch_operands = 0 : i64, tpu.core_type = #tpu.core_type<tc>} {
    %c0 = arith.constant 0 : index
    %c0_0 = arith.constant 0 : index
    %c0_1 = arith.constant 0 : index
    %0 = vector.load %arg3[%c0, %c0_0, %c0_1] : memref<3x32x128xf32, #tpu.memory_space<vmem>>, vector<3x32x128xf32>
    %1 = vector.extract_strided_slice %0 {offsets = [0, 0, 0], sizes = [1, 32, 128], strides = [1, 1, 1]} : vector<3x32x128xf32> to vector<1x32x128xf32>
    %2 = vector.shape_cast %1 : vector<1x32x128xf32> to vector<32x128xf32>
    %3 = vector.extract_strided_slice %0 {offsets = [1, 0, 0], sizes = [1, 32, 128], strides = [1, 1, 1]} : vector<3x32x128xf32> to vector<1x32x128xf32>
    %4 = vector.shape_cast %3 : vector<1x32x128xf32> to vector<32x128xf32>
    %5 = vector.extract_strided_slice %0 {offsets = [2, 0, 0], sizes = [1, 32, 128], strides = [1, 1, 1]} : vector<3x32x128xf32> to vector<1x32x128xf32>
    %6 = vector.shape_cast %5 : vector<1x32x128xf32> to vector<32x128xf32>
    %c0_2 = arith.constant 0 : index
    %c0_3 = arith.constant 0 : index
    %c0_4 = arith.constant 0 : index
    %7 = vector.load %arg4[%c0_2, %c0_3, %c0_4] : memref<2x1x128xf32, #tpu.memory_space<vmem>>, vector<2x1x128xf32>
    %8 = vector.extract_strided_slice %7 {offsets = [1, 0, 0], sizes = [1, 1, 128], strides = [1, 1, 1]} : vector<2x1x128xf32> to vector<1x1x128xf32>
    %9 = vector.shape_cast %8 : vector<1x1x128xf32> to vector<1x128xf32>
    %10 = vector.shape_cast %9 : vector<1x128xf32> to vector<1x128xf32>
    %11 = vector.broadcast %10 : vector<1x128xf32> to vector<8x128xf32>
    %c0_5 = arith.constant 0 : index
    %c0_6 = arith.constant 0 : index
    %12 = vector.load %arg0[%c0_5, %c0_6] : memref<64x16xf32, #tpu.memory_space<vmem>>, vector<64x16xf32>
    %c0_7 = arith.constant 0 : index
    %c0_8 = arith.constant 0 : index
    %13 = vector.load %arg2[%c0_7, %c0_8] : memref<16x128xf32, #tpu.memory_space<vmem>>, vector<16x128xf32>
    %cst = arith.constant dense<0.000000e+00> : vector<64x128xf32>
    %14 = tpu.matmul %12, %13, %cst {dimension_numbers = #tpu.dot_dimension_numbers<[1], [0], [0], [1], [0, 0, 1, 1], [], []>} : vector<64x16xf32>, vector<16x128xf32>, vector<64x128xf32> -> vector<64x128xf32>
    %15 = vector.extract_strided_slice %7 {offsets = [0, 0, 0], sizes = [1, 1, 128], strides = [1, 1, 1]} : vector<2x1x128xf32> to vector<1x1x128xf32>
    %16 = vector.shape_cast %15 : vector<1x1x128xf32> to vector<1x128xf32>
    %17 = vector.broadcast %16 : vector<1x128xf32> to vector<64x128xf32>
    %18 = arith.addf %14, %17 : vector<64x128xf32>
    %19 = vector.shape_cast %18 : vector<64x128xf32> to vector<8x8x128xf32>
    %cst_9 = arith.constant 0.000000e+00 : f32
    %20 = vector.broadcast %cst_9 : f32 to vector<8x32xf32>
    %cst_10 = arith.constant 0.000000e+00 : f32
    %21 = vector.broadcast %cst_10 : f32 to vector<8x32xf32>
    %22 = vector.extract_strided_slice %19 {offsets = [0, 0, 0], sizes = [1, 8, 128], strides = [1, 1, 1]} : vector<8x8x128xf32> to vector<1x8x128xf32>
    %23 = vector.shape_cast %22 : vector<1x8x128xf32> to vector<8x128xf32>
    %cst_11 = arith.constant dense<0.000000e+00> : vector<8x128xf32>
    %24 = tpu.matmul %20, %2, %cst_11 {dimension_numbers = #tpu.dot_dimension_numbers<[1], [0], [0], [1], [0, 0, 1, 1], [], []>} : vector<8x32xf32>, vector<32x128xf32>, vector<8x128xf32> -> vector<8x128xf32>
    %25 = arith.addf %23, %24 : vector<8x128xf32>
    %26 = vector.extract_strided_slice %25 {offsets = [0, 0], sizes = [8, 64], strides = [1, 1]} : vector<8x128xf32> to vector<8x64xf32>
    %27 = arith.negf %26 : vector<8x64xf32>
    %28 = math.exp %27 : vector<8x64xf32>
    %cst_12 = arith.constant 1.000000e+00 : f32
    %29 = vector.broadcast %cst_12 : f32 to vector<8x64xf32>
    %30 = arith.addf %29, %28 : vector<8x64xf32>
    %31 = arith.divf %29, %30 : vector<8x64xf32>
    %32 = vector.extract_strided_slice %31 {offsets = [0, 0], sizes = [8, 32], strides = [1, 1]} : vector<8x64xf32> to vector<8x32xf32>
    %33 = vector.extract_strided_slice %31 {offsets = [0, 32], sizes = [8, 32], strides = [1, 1]} : vector<8x64xf32> to vector<8x32xf32>
    %34 = vector.extract_strided_slice %25 {offsets = [0, 64], sizes = [8, 32], strides = [1, 1]} : vector<8x128xf32> to vector<8x32xf32>
    %35 = vector.extract_strided_slice %25 {offsets = [0, 96], sizes = [8, 32], strides = [1, 1]} : vector<8x128xf32> to vector<8x32xf32>
    %36 = arith.mulf %32, %35 : vector<8x32xf32>
    %37 = arith.addf %34, %36 : vector<8x32xf32>
    %38 = math.tanh %37 : vector<8x32xf32>
    %cst_13 = arith.constant 1.000000e+00 : f32
    %39 = vector.broadcast %cst_13 : f32 to vector<8x32xf32>
    %40 = arith.subf %39, %33 : vector<8x32xf32>
    %41 = arith.mulf %40, %38 : vector<8x32xf32>
    %42 = arith.mulf %33, %20 : vector<8x32xf32>
    %43 = arith.addf %41, %42 : vector<8x32xf32>
    %cst_14 = arith.constant dense<0.000000e+00> : vector<8x128xf32>
    %44 = tpu.matmul %43, %4, %cst_14 {dimension_numbers = #tpu.dot_dimension_numbers<[1], [0], [0], [1], [0, 0, 1, 1], [], []>} : vector<8x32xf32>, vector<32x128xf32>, vector<8x128xf32> -> vector<8x128xf32>
    %cst_15 = arith.constant dense<0.000000e+00> : vector<8x128xf32>
    %45 = tpu.matmul %21, %6, %cst_15 {dimension_numbers = #tpu.dot_dimension_numbers<[1], [0], [0], [1], [0, 0, 1, 1], [], []>} : vector<8x32xf32>, vector<32x128xf32>, vector<8x128xf32> -> vector<8x128xf32>
    %46 = arith.addf %44, %45 : vector<8x128xf32>
    %47 = arith.addf %46, %11 : vector<8x128xf32>
    %48 = vector.extract_strided_slice %47 {offsets = [0, 0], sizes = [8, 64], strides = [1, 1]} : vector<8x128xf32> to vector<8x64xf32>
    %49 = arith.negf %48 : vector<8x64xf32>
    %50 = math.exp %49 : vector<8x64xf32>
    %cst_16 = arith.constant 1.000000e+00 : f32
    %51 = vector.broadcast %cst_16 : f32 to vector<8x64xf32>
    %52 = arith.addf %51, %50 : vector<8x64xf32>
    %53 = arith.divf %51, %52 : vector<8x64xf32>
    %54 = vector.extract_strided_slice %53 {offsets = [0, 0], sizes = [8, 32], strides = [1, 1]} : vector<8x64xf32> to vector<8x32xf32>
    %55 = vector.extract_strided_slice %53 {offsets = [0, 32], sizes = [8, 32], strides = [1, 1]} : vector<8x64xf32> to vector<8x32xf32>
    %56 = vector.extract_strided_slice %47 {offsets = [0, 64], sizes = [8, 32], strides = [1, 1]} : vector<8x128xf32> to vector<8x32xf32>
    %57 = vector.extract_strided_slice %47 {offsets = [0, 96], sizes = [8, 32], strides = [1, 1]} : vector<8x128xf32> to vector<8x32xf32>
    %58 = arith.mulf %54, %57 : vector<8x32xf32>
    %59 = arith.addf %56, %58 : vector<8x32xf32>
    %60 = math.tanh %59 : vector<8x32xf32>
    %cst_17 = arith.constant 1.000000e+00 : f32
    %61 = vector.broadcast %cst_17 : f32 to vector<8x32xf32>
    %62 = arith.subf %61, %55 : vector<8x32xf32>
    %63 = arith.mulf %62, %60 : vector<8x32xf32>
    %64 = arith.mulf %55, %21 : vector<8x32xf32>
    %65 = arith.addf %63, %64 : vector<8x32xf32>
    %66 = vector.extract_strided_slice %19 {offsets = [1, 0, 0], sizes = [1, 8, 128], strides = [1, 1, 1]} : vector<8x8x128xf32> to vector<1x8x128xf32>
    %67 = vector.shape_cast %66 : vector<1x8x128xf32> to vector<8x128xf32>
    %cst_18 = arith.constant dense<0.000000e+00> : vector<8x128xf32>
    %68 = tpu.matmul %43, %2, %cst_18 {dimension_numbers = #tpu.dot_dimension_numbers<[1], [0], [0], [1], [0, 0, 1, 1], [], []>} : vector<8x32xf32>, vector<32x128xf32>, vector<8x128xf32> -> vector<8x128xf32>
    %69 = arith.addf %67, %68 : vector<8x128xf32>
    %70 = vector.extract_strided_slice %69 {offsets = [0, 0], sizes = [8, 64], strides = [1, 1]} : vector<8x128xf32> to vector<8x64xf32>
    %71 = arith.negf %70 : vector<8x64xf32>
    %72 = math.exp %71 : vector<8x64xf32>
    %cst_19 = arith.constant 1.000000e+00 : f32
    %73 = vector.broadcast %cst_19 : f32 to vector<8x64xf32>
    %74 = arith.addf %73, %72 : vector<8x64xf32>
    %75 = arith.divf %73, %74 : vector<8x64xf32>
    %76 = vector.extract_strided_slice %75 {offsets = [0, 0], sizes = [8, 32], strides = [1, 1]} : vector<8x64xf32> to vector<8x32xf32>
    %77 = vector.extract_strided_slice %75 {offsets = [0, 32], sizes = [8, 32], strides = [1, 1]} : vector<8x64xf32> to vector<8x32xf32>
    %78 = vector.extract_strided_slice %69 {offsets = [0, 64], sizes = [8, 32], strides = [1, 1]} : vector<8x128xf32> to vector<8x32xf32>
    %79 = vector.extract_strided_slice %69 {offsets = [0, 96], sizes = [8, 32], strides = [1, 1]} : vector<8x128xf32> to vector<8x32xf32>
    %80 = arith.mulf %76, %79 : vector<8x32xf32>
    %81 = arith.addf %78, %80 : vector<8x32xf32>
    %82 = math.tanh %81 : vector<8x32xf32>
    %cst_20 = arith.constant 1.000000e+00 : f32
    %83 = vector.broadcast %cst_20 : f32 to vector<8x32xf32>
    %84 = arith.subf %83, %77 : vector<8x32xf32>
    %85 = arith.mulf %84, %82 : vector<8x32xf32>
    %86 = arith.mulf %77, %43 : vector<8x32xf32>
    %87 = arith.addf %85, %86 : vector<8x32xf32>
    %cst_21 = arith.constant dense<0.000000e+00> : vector<8x128xf32>
    %88 = tpu.matmul %87, %4, %cst_21 {dimension_numbers = #tpu.dot_dimension_numbers<[1], [0], [0], [1], [0, 0, 1, 1], [], []>} : vector<8x32xf32>, vector<32x128xf32>, vector<8x128xf32> -> vector<8x128xf32>
    %cst_22 = arith.constant dense<0.000000e+00> : vector<8x128xf32>
    %89 = tpu.matmul %65, %6, %cst_22 {dimension_numbers = #tpu.dot_dimension_numbers<[1], [0], [0], [1], [0, 0, 1, 1], [], []>} : vector<8x32xf32>, vector<32x128xf32>, vector<8x128xf32> -> vector<8x128xf32>
    %90 = arith.addf %88, %89 : vector<8x128xf32>
    %91 = arith.addf %90, %11 : vector<8x128xf32>
    %92 = vector.extract_strided_slice %91 {offsets = [0, 0], sizes = [8, 64], strides = [1, 1]} : vector<8x128xf32> to vector<8x64xf32>
    %93 = arith.negf %92 : vector<8x64xf32>
    %94 = math.exp %93 : vector<8x64xf32>
    %cst_23 = arith.constant 1.000000e+00 : f32
    %95 = vector.broadcast %cst_23 : f32 to vector<8x64xf32>
    %96 = arith.addf %95, %94 : vector<8x64xf32>
    %97 = arith.divf %95, %96 : vector<8x64xf32>
    %98 = vector.extract_strided_slice %97 {offsets = [0, 0], sizes = [8, 32], strides = [1, 1]} : vector<8x64xf32> to vector<8x32xf32>
    %99 = vector.extract_strided_slice %97 {offsets = [0, 32], sizes = [8, 32], strides = [1, 1]} : vector<8x64xf32> to vector<8x32xf32>
    %100 = vector.extract_strided_slice %91 {offsets = [0, 64], sizes = [8, 32], strides = [1, 1]} : vector<8x128xf32> to vector<8x32xf32>
    %101 = vector.extract_strided_slice %91 {offsets = [0, 96], sizes = [8, 32], strides = [1, 1]} : vector<8x128xf32> to vector<8x32xf32>
    %102 = arith.mulf %98, %101 : vector<8x32xf32>
    %103 = arith.addf %100, %102 : vector<8x32xf32>
    %104 = math.tanh %103 : vector<8x32xf32>
    %cst_24 = arith.constant 1.000000e+00 : f32
    %105 = vector.broadcast %cst_24 : f32 to vector<8x32xf32>
    %106 = arith.subf %105, %99 : vector<8x32xf32>
    %107 = arith.mulf %106, %104 : vector<8x32xf32>
    %108 = arith.mulf %99, %65 : vector<8x32xf32>
    %109 = arith.addf %107, %108 : vector<8x32xf32>
    %110 = vector.extract_strided_slice %19 {offsets = [2, 0, 0], sizes = [1, 8, 128], strides = [1, 1, 1]} : vector<8x8x128xf32> to vector<1x8x128xf32>
    %111 = vector.shape_cast %110 : vector<1x8x128xf32> to vector<8x128xf32>
    %cst_25 = arith.constant dense<0.000000e+00> : vector<8x128xf32>
    %112 = tpu.matmul %87, %2, %cst_25 {dimension_numbers = #tpu.dot_dimension_numbers<[1], [0], [0], [1], [0, 0, 1, 1], [], []>} : vector<8x32xf32>, vector<32x128xf32>, vector<8x128xf32> -> vector<8x128xf32>
    %113 = arith.addf %111, %112 : vector<8x128xf32>
    %114 = vector.extract_strided_slice %113 {offsets = [0, 0], sizes = [8, 64], strides = [1, 1]} : vector<8x128xf32> to vector<8x64xf32>
    %115 = arith.negf %114 : vector<8x64xf32>
    %116 = math.exp %115 : vector<8x64xf32>
    %cst_26 = arith.constant 1.000000e+00 : f32
    %117 = vector.broadcast %cst_26 : f32 to vector<8x64xf32>
    %118 = arith.addf %117, %116 : vector<8x64xf32>
    %119 = arith.divf %117, %118 : vector<8x64xf32>
    %120 = vector.extract_strided_slice %119 {offsets = [0, 0], sizes = [8, 32], strides = [1, 1]} : vector<8x64xf32> to vector<8x32xf32>
    %121 = vector.extract_strided_slice %119 {offsets = [0, 32], sizes = [8, 32], strides = [1, 1]} : vector<8x64xf32> to vector<8x32xf32>
    %122 = vector.extract_strided_slice %113 {offsets = [0, 64], sizes = [8, 32], strides = [1, 1]} : vector<8x128xf32> to vector<8x32xf32>
    %123 = vector.extract_strided_slice %113 {offsets = [0, 96], sizes = [8, 32], strides = [1, 1]} : vector<8x128xf32> to vector<8x32xf32>
    %124 = arith.mulf %120, %123 : vector<8x32xf32>
    %125 = arith.addf %122, %124 : vector<8x32xf32>
    %126 = math.tanh %125 : vector<8x32xf32>
    %cst_27 = arith.constant 1.000000e+00 : f32
    %127 = vector.broadcast %cst_27 : f32 to vector<8x32xf32>
    %128 = arith.subf %127, %121 : vector<8x32xf32>
    %129 = arith.mulf %128, %126 : vector<8x32xf32>
    %130 = arith.mulf %121, %87 : vector<8x32xf32>
    %131 = arith.addf %129, %130 : vector<8x32xf32>
    %cst_28 = arith.constant dense<0.000000e+00> : vector<8x128xf32>
    %132 = tpu.matmul %131, %4, %cst_28 {dimension_numbers = #tpu.dot_dimension_numbers<[1], [0], [0], [1], [0, 0, 1, 1], [], []>} : vector<8x32xf32>, vector<32x128xf32>, vector<8x128xf32> -> vector<8x128xf32>
    %cst_29 = arith.constant dense<0.000000e+00> : vector<8x128xf32>
    %133 = tpu.matmul %109, %6, %cst_29 {dimension_numbers = #tpu.dot_dimension_numbers<[1], [0], [0], [1], [0, 0, 1, 1], [], []>} : vector<8x32xf32>, vector<32x128xf32>, vector<8x128xf32> -> vector<8x128xf32>
    %134 = arith.addf %132, %133 : vector<8x128xf32>
    %135 = arith.addf %134, %11 : vector<8x128xf32>
    %136 = vector.extract_strided_slice %135 {offsets = [0, 0], sizes = [8, 64], strides = [1, 1]} : vector<8x128xf32> to vector<8x64xf32>
    %137 = arith.negf %136 : vector<8x64xf32>
    %138 = math.exp %137 : vector<8x64xf32>
    %cst_30 = arith.constant 1.000000e+00 : f32
    %139 = vector.broadcast %cst_30 : f32 to vector<8x64xf32>
    %140 = arith.addf %139, %138 : vector<8x64xf32>
    %141 = arith.divf %139, %140 : vector<8x64xf32>
    %142 = vector.extract_strided_slice %141 {offsets = [0, 0], sizes = [8, 32], strides = [1, 1]} : vector<8x64xf32> to vector<8x32xf32>
    %143 = vector.extract_strided_slice %141 {offsets = [0, 32], sizes = [8, 32], strides = [1, 1]} : vector<8x64xf32> to vector<8x32xf32>
    %144 = vector.extract_strided_slice %135 {offsets = [0, 64], sizes = [8, 32], strides = [1, 1]} : vector<8x128xf32> to vector<8x32xf32>
    %145 = vector.extract_strided_slice %135 {offsets = [0, 96], sizes = [8, 32], strides = [1, 1]} : vector<8x128xf32> to vector<8x32xf32>
    %146 = arith.mulf %142, %145 : vector<8x32xf32>
    %147 = arith.addf %144, %146 : vector<8x32xf32>
    %148 = math.tanh %147 : vector<8x32xf32>
    %cst_31 = arith.constant 1.000000e+00 : f32
    %149 = vector.broadcast %cst_31 : f32 to vector<8x32xf32>
    %150 = arith.subf %149, %143 : vector<8x32xf32>
    %151 = arith.mulf %150, %148 : vector<8x32xf32>
    %152 = arith.mulf %143, %109 : vector<8x32xf32>
    %153 = arith.addf %151, %152 : vector<8x32xf32>
    %154 = vector.extract_strided_slice %19 {offsets = [3, 0, 0], sizes = [1, 8, 128], strides = [1, 1, 1]} : vector<8x8x128xf32> to vector<1x8x128xf32>
    %155 = vector.shape_cast %154 : vector<1x8x128xf32> to vector<8x128xf32>
    %cst_32 = arith.constant dense<0.000000e+00> : vector<8x128xf32>
    %156 = tpu.matmul %131, %2, %cst_32 {dimension_numbers = #tpu.dot_dimension_numbers<[1], [0], [0], [1], [0, 0, 1, 1], [], []>} : vector<8x32xf32>, vector<32x128xf32>, vector<8x128xf32> -> vector<8x128xf32>
    %157 = arith.addf %155, %156 : vector<8x128xf32>
    %158 = vector.extract_strided_slice %157 {offsets = [0, 0], sizes = [8, 64], strides = [1, 1]} : vector<8x128xf32> to vector<8x64xf32>
    %159 = arith.negf %158 : vector<8x64xf32>
    %160 = math.exp %159 : vector<8x64xf32>
    %cst_33 = arith.constant 1.000000e+00 : f32
    %161 = vector.broadcast %cst_33 : f32 to vector<8x64xf32>
    %162 = arith.addf %161, %160 : vector<8x64xf32>
    %163 = arith.divf %161, %162 : vector<8x64xf32>
    %164 = vector.extract_strided_slice %163 {offsets = [0, 0], sizes = [8, 32], strides = [1, 1]} : vector<8x64xf32> to vector<8x32xf32>
    %165 = vector.extract_strided_slice %163 {offsets = [0, 32], sizes = [8, 32], strides = [1, 1]} : vector<8x64xf32> to vector<8x32xf32>
    %166 = vector.extract_strided_slice %157 {offsets = [0, 64], sizes = [8, 32], strides = [1, 1]} : vector<8x128xf32> to vector<8x32xf32>
    %167 = vector.extract_strided_slice %157 {offsets = [0, 96], sizes = [8, 32], strides = [1, 1]} : vector<8x128xf32> to vector<8x32xf32>
    %168 = arith.mulf %164, %167 : vector<8x32xf32>
    %169 = arith.addf %166, %168 : vector<8x32xf32>
    %170 = math.tanh %169 : vector<8x32xf32>
    %cst_34 = arith.constant 1.000000e+00 : f32
    %171 = vector.broadcast %cst_34 : f32 to vector<8x32xf32>
    %172 = arith.subf %171, %165 : vector<8x32xf32>
    %173 = arith.mulf %172, %170 : vector<8x32xf32>
    %174 = arith.mulf %165, %131 : vector<8x32xf32>
    %175 = arith.addf %173, %174 : vector<8x32xf32>
    %cst_35 = arith.constant dense<0.000000e+00> : vector<8x128xf32>
    %176 = tpu.matmul %175, %4, %cst_35 {dimension_numbers = #tpu.dot_dimension_numbers<[1], [0], [0], [1], [0, 0, 1, 1], [], []>} : vector<8x32xf32>, vector<32x128xf32>, vector<8x128xf32> -> vector<8x128xf32>
    %cst_36 = arith.constant dense<0.000000e+00> : vector<8x128xf32>
    %177 = tpu.matmul %153, %6, %cst_36 {dimension_numbers = #tpu.dot_dimension_numbers<[1], [0], [0], [1], [0, 0, 1, 1], [], []>} : vector<8x32xf32>, vector<32x128xf32>, vector<8x128xf32> -> vector<8x128xf32>
    %178 = arith.addf %176, %177 : vector<8x128xf32>
    %179 = arith.addf %178, %11 : vector<8x128xf32>
    %180 = vector.extract_strided_slice %179 {offsets = [0, 0], sizes = [8, 64], strides = [1, 1]} : vector<8x128xf32> to vector<8x64xf32>
    %181 = arith.negf %180 : vector<8x64xf32>
    %182 = math.exp %181 : vector<8x64xf32>
    %cst_37 = arith.constant 1.000000e+00 : f32
    %183 = vector.broadcast %cst_37 : f32 to vector<8x64xf32>
    %184 = arith.addf %183, %182 : vector<8x64xf32>
    %185 = arith.divf %183, %184 : vector<8x64xf32>
    %186 = vector.extract_strided_slice %185 {offsets = [0, 0], sizes = [8, 32], strides = [1, 1]} : vector<8x64xf32> to vector<8x32xf32>
    %187 = vector.extract_strided_slice %185 {offsets = [0, 32], sizes = [8, 32], strides = [1, 1]} : vector<8x64xf32> to vector<8x32xf32>
    %188 = vector.extract_strided_slice %179 {offsets = [0, 64], sizes = [8, 32], strides = [1, 1]} : vector<8x128xf32> to vector<8x32xf32>
    %189 = vector.extract_strided_slice %179 {offsets = [0, 96], sizes = [8, 32], strides = [1, 1]} : vector<8x128xf32> to vector<8x32xf32>
    %190 = arith.mulf %186, %189 : vector<8x32xf32>
    %191 = arith.addf %188, %190 : vector<8x32xf32>
    %192 = math.tanh %191 : vector<8x32xf32>
    %cst_38 = arith.constant 1.000000e+00 : f32
    %193 = vector.broadcast %cst_38 : f32 to vector<8x32xf32>
    %194 = arith.subf %193, %187 : vector<8x32xf32>
    %195 = arith.mulf %194, %192 : vector<8x32xf32>
    %196 = arith.mulf %187, %153 : vector<8x32xf32>
    %197 = arith.addf %195, %196 : vector<8x32xf32>
    %198 = vector.extract_strided_slice %19 {offsets = [4, 0, 0], sizes = [1, 8, 128], strides = [1, 1, 1]} : vector<8x8x128xf32> to vector<1x8x128xf32>
    %199 = vector.shape_cast %198 : vector<1x8x128xf32> to vector<8x128xf32>
    %cst_39 = arith.constant dense<0.000000e+00> : vector<8x128xf32>
    %200 = tpu.matmul %175, %2, %cst_39 {dimension_numbers = #tpu.dot_dimension_numbers<[1], [0], [0], [1], [0, 0, 1, 1], [], []>} : vector<8x32xf32>, vector<32x128xf32>, vector<8x128xf32> -> vector<8x128xf32>
    %201 = arith.addf %199, %200 : vector<8x128xf32>
    %202 = vector.extract_strided_slice %201 {offsets = [0, 0], sizes = [8, 64], strides = [1, 1]} : vector<8x128xf32> to vector<8x64xf32>
    %203 = arith.negf %202 : vector<8x64xf32>
    %204 = math.exp %203 : vector<8x64xf32>
    %cst_40 = arith.constant 1.000000e+00 : f32
    %205 = vector.broadcast %cst_40 : f32 to vector<8x64xf32>
    %206 = arith.addf %205, %204 : vector<8x64xf32>
    %207 = arith.divf %205, %206 : vector<8x64xf32>
    %208 = vector.extract_strided_slice %207 {offsets = [0, 0], sizes = [8, 32], strides = [1, 1]} : vector<8x64xf32> to vector<8x32xf32>
    %209 = vector.extract_strided_slice %207 {offsets = [0, 32], sizes = [8, 32], strides = [1, 1]} : vector<8x64xf32> to vector<8x32xf32>
    %210 = vector.extract_strided_slice %201 {offsets = [0, 64], sizes = [8, 32], strides = [1, 1]} : vector<8x128xf32> to vector<8x32xf32>
    %211 = vector.extract_strided_slice %201 {offsets = [0, 96], sizes = [8, 32], strides = [1, 1]} : vector<8x128xf32> to vector<8x32xf32>
    %212 = arith.mulf %208, %211 : vector<8x32xf32>
    %213 = arith.addf %210, %212 : vector<8x32xf32>
    %214 = math.tanh %213 : vector<8x32xf32>
    %cst_41 = arith.constant 1.000000e+00 : f32
    %215 = vector.broadcast %cst_41 : f32 to vector<8x32xf32>
    %216 = arith.subf %215, %209 : vector<8x32xf32>
    %217 = arith.mulf %216, %214 : vector<8x32xf32>
    %218 = arith.mulf %209, %175 : vector<8x32xf32>
    %219 = arith.addf %217, %218 : vector<8x32xf32>
    %cst_42 = arith.constant dense<0.000000e+00> : vector<8x128xf32>
    %220 = tpu.matmul %219, %4, %cst_42 {dimension_numbers = #tpu.dot_dimension_numbers<[1], [0], [0], [1], [0, 0, 1, 1], [], []>} : vector<8x32xf32>, vector<32x128xf32>, vector<8x128xf32> -> vector<8x128xf32>
    %cst_43 = arith.constant dense<0.000000e+00> : vector<8x128xf32>
    %221 = tpu.matmul %197, %6, %cst_43 {dimension_numbers = #tpu.dot_dimension_numbers<[1], [0], [0], [1], [0, 0, 1, 1], [], []>} : vector<8x32xf32>, vector<32x128xf32>, vector<8x128xf32> -> vector<8x128xf32>
    %222 = arith.addf %220, %221 : vector<8x128xf32>
    %223 = arith.addf %222, %11 : vector<8x128xf32>
    %224 = vector.extract_strided_slice %223 {offsets = [0, 0], sizes = [8, 64], strides = [1, 1]} : vector<8x128xf32> to vector<8x64xf32>
    %225 = arith.negf %224 : vector<8x64xf32>
    %226 = math.exp %225 : vector<8x64xf32>
    %cst_44 = arith.constant 1.000000e+00 : f32
    %227 = vector.broadcast %cst_44 : f32 to vector<8x64xf32>
    %228 = arith.addf %227, %226 : vector<8x64xf32>
    %229 = arith.divf %227, %228 : vector<8x64xf32>
    %230 = vector.extract_strided_slice %229 {offsets = [0, 0], sizes = [8, 32], strides = [1, 1]} : vector<8x64xf32> to vector<8x32xf32>
    %231 = vector.extract_strided_slice %229 {offsets = [0, 32], sizes = [8, 32], strides = [1, 1]} : vector<8x64xf32> to vector<8x32xf32>
    %232 = vector.extract_strided_slice %223 {offsets = [0, 64], sizes = [8, 32], strides = [1, 1]} : vector<8x128xf32> to vector<8x32xf32>
    %233 = vector.extract_strided_slice %223 {offsets = [0, 96], sizes = [8, 32], strides = [1, 1]} : vector<8x128xf32> to vector<8x32xf32>
    %234 = arith.mulf %230, %233 : vector<8x32xf32>
    %235 = arith.addf %232, %234 : vector<8x32xf32>
    %236 = math.tanh %235 : vector<8x32xf32>
    %cst_45 = arith.constant 1.000000e+00 : f32
    %237 = vector.broadcast %cst_45 : f32 to vector<8x32xf32>
    %238 = arith.subf %237, %231 : vector<8x32xf32>
    %239 = arith.mulf %238, %236 : vector<8x32xf32>
    %240 = arith.mulf %231, %197 : vector<8x32xf32>
    %241 = arith.addf %239, %240 : vector<8x32xf32>
    %242 = vector.extract_strided_slice %19 {offsets = [5, 0, 0], sizes = [1, 8, 128], strides = [1, 1, 1]} : vector<8x8x128xf32> to vector<1x8x128xf32>
    %243 = vector.shape_cast %242 : vector<1x8x128xf32> to vector<8x128xf32>
    %cst_46 = arith.constant dense<0.000000e+00> : vector<8x128xf32>
    %244 = tpu.matmul %219, %2, %cst_46 {dimension_numbers = #tpu.dot_dimension_numbers<[1], [0], [0], [1], [0, 0, 1, 1], [], []>} : vector<8x32xf32>, vector<32x128xf32>, vector<8x128xf32> -> vector<8x128xf32>
    %245 = arith.addf %243, %244 : vector<8x128xf32>
    %246 = vector.extract_strided_slice %245 {offsets = [0, 0], sizes = [8, 64], strides = [1, 1]} : vector<8x128xf32> to vector<8x64xf32>
    %247 = arith.negf %246 : vector<8x64xf32>
    %248 = math.exp %247 : vector<8x64xf32>
    %cst_47 = arith.constant 1.000000e+00 : f32
    %249 = vector.broadcast %cst_47 : f32 to vector<8x64xf32>
    %250 = arith.addf %249, %248 : vector<8x64xf32>
    %251 = arith.divf %249, %250 : vector<8x64xf32>
    %252 = vector.extract_strided_slice %251 {offsets = [0, 0], sizes = [8, 32], strides = [1, 1]} : vector<8x64xf32> to vector<8x32xf32>
    %253 = vector.extract_strided_slice %251 {offsets = [0, 32], sizes = [8, 32], strides = [1, 1]} : vector<8x64xf32> to vector<8x32xf32>
    %254 = vector.extract_strided_slice %245 {offsets = [0, 64], sizes = [8, 32], strides = [1, 1]} : vector<8x128xf32> to vector<8x32xf32>
    %255 = vector.extract_strided_slice %245 {offsets = [0, 96], sizes = [8, 32], strides = [1, 1]} : vector<8x128xf32> to vector<8x32xf32>
    %256 = arith.mulf %252, %255 : vector<8x32xf32>
    %257 = arith.addf %254, %256 : vector<8x32xf32>
    %258 = math.tanh %257 : vector<8x32xf32>
    %cst_48 = arith.constant 1.000000e+00 : f32
    %259 = vector.broadcast %cst_48 : f32 to vector<8x32xf32>
    %260 = arith.subf %259, %253 : vector<8x32xf32>
    %261 = arith.mulf %260, %258 : vector<8x32xf32>
    %262 = arith.mulf %253, %219 : vector<8x32xf32>
    %263 = arith.addf %261, %262 : vector<8x32xf32>
    %cst_49 = arith.constant dense<0.000000e+00> : vector<8x128xf32>
    %264 = tpu.matmul %263, %4, %cst_49 {dimension_numbers = #tpu.dot_dimension_numbers<[1], [0], [0], [1], [0, 0, 1, 1], [], []>} : vector<8x32xf32>, vector<32x128xf32>, vector<8x128xf32> -> vector<8x128xf32>
    %cst_50 = arith.constant dense<0.000000e+00> : vector<8x128xf32>
    %265 = tpu.matmul %241, %6, %cst_50 {dimension_numbers = #tpu.dot_dimension_numbers<[1], [0], [0], [1], [0, 0, 1, 1], [], []>} : vector<8x32xf32>, vector<32x128xf32>, vector<8x128xf32> -> vector<8x128xf32>
    %266 = arith.addf %264, %265 : vector<8x128xf32>
    %267 = arith.addf %266, %11 : vector<8x128xf32>
    %268 = vector.extract_strided_slice %267 {offsets = [0, 0], sizes = [8, 64], strides = [1, 1]} : vector<8x128xf32> to vector<8x64xf32>
    %269 = arith.negf %268 : vector<8x64xf32>
    %270 = math.exp %269 : vector<8x64xf32>
    %cst_51 = arith.constant 1.000000e+00 : f32
    %271 = vector.broadcast %cst_51 : f32 to vector<8x64xf32>
    %272 = arith.addf %271, %270 : vector<8x64xf32>
    %273 = arith.divf %271, %272 : vector<8x64xf32>
    %274 = vector.extract_strided_slice %273 {offsets = [0, 0], sizes = [8, 32], strides = [1, 1]} : vector<8x64xf32> to vector<8x32xf32>
    %275 = vector.extract_strided_slice %273 {offsets = [0, 32], sizes = [8, 32], strides = [1, 1]} : vector<8x64xf32> to vector<8x32xf32>
    %276 = vector.extract_strided_slice %267 {offsets = [0, 64], sizes = [8, 32], strides = [1, 1]} : vector<8x128xf32> to vector<8x32xf32>
    %277 = vector.extract_strided_slice %267 {offsets = [0, 96], sizes = [8, 32], strides = [1, 1]} : vector<8x128xf32> to vector<8x32xf32>
    %278 = arith.mulf %274, %277 : vector<8x32xf32>
    %279 = arith.addf %276, %278 : vector<8x32xf32>
    %280 = math.tanh %279 : vector<8x32xf32>
    %cst_52 = arith.constant 1.000000e+00 : f32
    %281 = vector.broadcast %cst_52 : f32 to vector<8x32xf32>
    %282 = arith.subf %281, %275 : vector<8x32xf32>
    %283 = arith.mulf %282, %280 : vector<8x32xf32>
    %284 = arith.mulf %275, %241 : vector<8x32xf32>
    %285 = arith.addf %283, %284 : vector<8x32xf32>
    %286 = vector.extract_strided_slice %19 {offsets = [6, 0, 0], sizes = [1, 8, 128], strides = [1, 1, 1]} : vector<8x8x128xf32> to vector<1x8x128xf32>
    %287 = vector.shape_cast %286 : vector<1x8x128xf32> to vector<8x128xf32>
    %cst_53 = arith.constant dense<0.000000e+00> : vector<8x128xf32>
    %288 = tpu.matmul %263, %2, %cst_53 {dimension_numbers = #tpu.dot_dimension_numbers<[1], [0], [0], [1], [0, 0, 1, 1], [], []>} : vector<8x32xf32>, vector<32x128xf32>, vector<8x128xf32> -> vector<8x128xf32>
    %289 = arith.addf %287, %288 : vector<8x128xf32>
    %290 = vector.extract_strided_slice %289 {offsets = [0, 0], sizes = [8, 64], strides = [1, 1]} : vector<8x128xf32> to vector<8x64xf32>
    %291 = arith.negf %290 : vector<8x64xf32>
    %292 = math.exp %291 : vector<8x64xf32>
    %cst_54 = arith.constant 1.000000e+00 : f32
    %293 = vector.broadcast %cst_54 : f32 to vector<8x64xf32>
    %294 = arith.addf %293, %292 : vector<8x64xf32>
    %295 = arith.divf %293, %294 : vector<8x64xf32>
    %296 = vector.extract_strided_slice %295 {offsets = [0, 0], sizes = [8, 32], strides = [1, 1]} : vector<8x64xf32> to vector<8x32xf32>
    %297 = vector.extract_strided_slice %295 {offsets = [0, 32], sizes = [8, 32], strides = [1, 1]} : vector<8x64xf32> to vector<8x32xf32>
    %298 = vector.extract_strided_slice %289 {offsets = [0, 64], sizes = [8, 32], strides = [1, 1]} : vector<8x128xf32> to vector<8x32xf32>
    %299 = vector.extract_strided_slice %289 {offsets = [0, 96], sizes = [8, 32], strides = [1, 1]} : vector<8x128xf32> to vector<8x32xf32>
    %300 = arith.mulf %296, %299 : vector<8x32xf32>
    %301 = arith.addf %298, %300 : vector<8x32xf32>
    %302 = math.tanh %301 : vector<8x32xf32>
    %cst_55 = arith.constant 1.000000e+00 : f32
    %303 = vector.broadcast %cst_55 : f32 to vector<8x32xf32>
    %304 = arith.subf %303, %297 : vector<8x32xf32>
    %305 = arith.mulf %304, %302 : vector<8x32xf32>
    %306 = arith.mulf %297, %263 : vector<8x32xf32>
    %307 = arith.addf %305, %306 : vector<8x32xf32>
    %cst_56 = arith.constant dense<0.000000e+00> : vector<8x128xf32>
    %308 = tpu.matmul %307, %4, %cst_56 {dimension_numbers = #tpu.dot_dimension_numbers<[1], [0], [0], [1], [0, 0, 1, 1], [], []>} : vector<8x32xf32>, vector<32x128xf32>, vector<8x128xf32> -> vector<8x128xf32>
    %cst_57 = arith.constant dense<0.000000e+00> : vector<8x128xf32>
    %309 = tpu.matmul %285, %6, %cst_57 {dimension_numbers = #tpu.dot_dimension_numbers<[1], [0], [0], [1], [0, 0, 1, 1], [], []>} : vector<8x32xf32>, vector<32x128xf32>, vector<8x128xf32> -> vector<8x128xf32>
    %310 = arith.addf %308, %309 : vector<8x128xf32>
    %311 = arith.addf %310, %11 : vector<8x128xf32>
    %312 = vector.extract_strided_slice %311 {offsets = [0, 0], sizes = [8, 64], strides = [1, 1]} : vector<8x128xf32> to vector<8x64xf32>
    %313 = arith.negf %312 : vector<8x64xf32>
    %314 = math.exp %313 : vector<8x64xf32>
    %cst_58 = arith.constant 1.000000e+00 : f32
    %315 = vector.broadcast %cst_58 : f32 to vector<8x64xf32>
    %316 = arith.addf %315, %314 : vector<8x64xf32>
    %317 = arith.divf %315, %316 : vector<8x64xf32>
    %318 = vector.extract_strided_slice %317 {offsets = [0, 0], sizes = [8, 32], strides = [1, 1]} : vector<8x64xf32> to vector<8x32xf32>
    %319 = vector.extract_strided_slice %317 {offsets = [0, 32], sizes = [8, 32], strides = [1, 1]} : vector<8x64xf32> to vector<8x32xf32>
    %320 = vector.extract_strided_slice %311 {offsets = [0, 64], sizes = [8, 32], strides = [1, 1]} : vector<8x128xf32> to vector<8x32xf32>
    %321 = vector.extract_strided_slice %311 {offsets = [0, 96], sizes = [8, 32], strides = [1, 1]} : vector<8x128xf32> to vector<8x32xf32>
    %322 = arith.mulf %318, %321 : vector<8x32xf32>
    %323 = arith.addf %320, %322 : vector<8x32xf32>
    %324 = math.tanh %323 : vector<8x32xf32>
    %cst_59 = arith.constant 1.000000e+00 : f32
    %325 = vector.broadcast %cst_59 : f32 to vector<8x32xf32>
    %326 = arith.subf %325, %319 : vector<8x32xf32>
    %327 = arith.mulf %326, %324 : vector<8x32xf32>
    %328 = arith.mulf %319, %285 : vector<8x32xf32>
    %329 = arith.addf %327, %328 : vector<8x32xf32>
    %330 = vector.extract_strided_slice %19 {offsets = [7, 0, 0], sizes = [1, 8, 128], strides = [1, 1, 1]} : vector<8x8x128xf32> to vector<1x8x128xf32>
    %331 = vector.shape_cast %330 : vector<1x8x128xf32> to vector<8x128xf32>
    %cst_60 = arith.constant dense<0.000000e+00> : vector<8x128xf32>
    %332 = tpu.matmul %307, %2, %cst_60 {dimension_numbers = #tpu.dot_dimension_numbers<[1], [0], [0], [1], [0, 0, 1, 1], [], []>} : vector<8x32xf32>, vector<32x128xf32>, vector<8x128xf32> -> vector<8x128xf32>
    %333 = arith.addf %331, %332 : vector<8x128xf32>
    %334 = vector.extract_strided_slice %333 {offsets = [0, 0], sizes = [8, 64], strides = [1, 1]} : vector<8x128xf32> to vector<8x64xf32>
    %335 = arith.negf %334 : vector<8x64xf32>
    %336 = math.exp %335 : vector<8x64xf32>
    %cst_61 = arith.constant 1.000000e+00 : f32
    %337 = vector.broadcast %cst_61 : f32 to vector<8x64xf32>
    %338 = arith.addf %337, %336 : vector<8x64xf32>
    %339 = arith.divf %337, %338 : vector<8x64xf32>
    %340 = vector.extract_strided_slice %339 {offsets = [0, 0], sizes = [8, 32], strides = [1, 1]} : vector<8x64xf32> to vector<8x32xf32>
    %341 = vector.extract_strided_slice %339 {offsets = [0, 32], sizes = [8, 32], strides = [1, 1]} : vector<8x64xf32> to vector<8x32xf32>
    %342 = vector.extract_strided_slice %333 {offsets = [0, 64], sizes = [8, 32], strides = [1, 1]} : vector<8x128xf32> to vector<8x32xf32>
    %343 = vector.extract_strided_slice %333 {offsets = [0, 96], sizes = [8, 32], strides = [1, 1]} : vector<8x128xf32> to vector<8x32xf32>
    %344 = arith.mulf %340, %343 : vector<8x32xf32>
    %345 = arith.addf %342, %344 : vector<8x32xf32>
    %346 = math.tanh %345 : vector<8x32xf32>
    %cst_62 = arith.constant 1.000000e+00 : f32
    %347 = vector.broadcast %cst_62 : f32 to vector<8x32xf32>
    %348 = arith.subf %347, %341 : vector<8x32xf32>
    %349 = arith.mulf %348, %346 : vector<8x32xf32>
    %350 = arith.mulf %341, %307 : vector<8x32xf32>
    %351 = arith.addf %349, %350 : vector<8x32xf32>
    %cst_63 = arith.constant dense<0.000000e+00> : vector<8x128xf32>
    %352 = tpu.matmul %351, %4, %cst_63 {dimension_numbers = #tpu.dot_dimension_numbers<[1], [0], [0], [1], [0, 0, 1, 1], [], []>} : vector<8x32xf32>, vector<32x128xf32>, vector<8x128xf32> -> vector<8x128xf32>
    %cst_64 = arith.constant dense<0.000000e+00> : vector<8x128xf32>
    %353 = tpu.matmul %329, %6, %cst_64 {dimension_numbers = #tpu.dot_dimension_numbers<[1], [0], [0], [1], [0, 0, 1, 1], [], []>} : vector<8x32xf32>, vector<32x128xf32>, vector<8x128xf32> -> vector<8x128xf32>
    %354 = arith.addf %352, %353 : vector<8x128xf32>
    %355 = arith.addf %354, %11 : vector<8x128xf32>
    %356 = vector.extract_strided_slice %355 {offsets = [0, 0], sizes = [8, 64], strides = [1, 1]} : vector<8x128xf32> to vector<8x64xf32>
    %357 = arith.negf %356 : vector<8x64xf32>
    %358 = math.exp %357 : vector<8x64xf32>
    %cst_65 = arith.constant 1.000000e+00 : f32
    %359 = vector.broadcast %cst_65 : f32 to vector<8x64xf32>
    %360 = arith.addf %359, %358 : vector<8x64xf32>
    %361 = arith.divf %359, %360 : vector<8x64xf32>
    %362 = vector.extract_strided_slice %361 {offsets = [0, 0], sizes = [8, 32], strides = [1, 1]} : vector<8x64xf32> to vector<8x32xf32>
    %363 = vector.extract_strided_slice %361 {offsets = [0, 32], sizes = [8, 32], strides = [1, 1]} : vector<8x64xf32> to vector<8x32xf32>
    %364 = vector.extract_strided_slice %355 {offsets = [0, 64], sizes = [8, 32], strides = [1, 1]} : vector<8x128xf32> to vector<8x32xf32>
    %365 = vector.extract_strided_slice %355 {offsets = [0, 96], sizes = [8, 32], strides = [1, 1]} : vector<8x128xf32> to vector<8x32xf32>
    %366 = arith.mulf %362, %365 : vector<8x32xf32>
    %367 = arith.addf %364, %366 : vector<8x32xf32>
    %368 = math.tanh %367 : vector<8x32xf32>
    %cst_66 = arith.constant 1.000000e+00 : f32
    %369 = vector.broadcast %cst_66 : f32 to vector<8x32xf32>
    %370 = arith.subf %369, %363 : vector<8x32xf32>
    %371 = arith.mulf %370, %368 : vector<8x32xf32>
    %372 = arith.mulf %363, %329 : vector<8x32xf32>
    %373 = arith.addf %371, %372 : vector<8x32xf32>
    %c0_67 = arith.constant 0 : index
    %c0_68 = arith.constant 0 : index
    %374 = vector.load %arg5[%c0_67, %c0_68] : memref<96x128xf32, #tpu.memory_space<vmem>>, vector<32x128xf32>
    %c32 = arith.constant 32 : index
    %c0_69 = arith.constant 0 : index
    %375 = vector.load %arg5[%c32, %c0_69] : memref<96x128xf32, #tpu.memory_space<vmem>>, vector<64x128xf32>
    %cst_70 = arith.constant 0.000000e+00 : f32
    %376 = vector.broadcast %cst_70 : f32 to vector<8x32xf32>
    %377 = arith.cmpf ogt, %373, %376 : vector<8x32xf32>
    %cst_71 = arith.constant 0.00999999977 : f32
    %378 = vector.broadcast %cst_71 : f32 to vector<8x32xf32>
    %379 = arith.mulf %378, %373 : vector<8x32xf32>
    %380 = arith.select %377, %373, %379 : vector<8x32xi1>, vector<8x32xf32>
    %cst_72 = arith.constant dense<0.000000e+00> : vector<8x128xf32>
    %381 = tpu.matmul %380, %374, %cst_72 {dimension_numbers = #tpu.dot_dimension_numbers<[1], [0], [0], [1], [0, 0, 1, 1], [], []>} : vector<8x32xf32>, vector<32x128xf32>, vector<8x128xf32> -> vector<8x128xf32>
    %c0_73 = arith.constant 0 : index
    %c0_74 = arith.constant 0 : index
    %382 = vector.load %arg1[%c0_73, %c0_74] : memref<8x64xf32, #tpu.memory_space<vmem>>, vector<8x64xf32>
    %cst_75 = arith.constant dense<0.000000e+00> : vector<8x128xf32>
    %383 = tpu.matmul %382, %375, %cst_75 {dimension_numbers = #tpu.dot_dimension_numbers<[1], [0], [0], [1], [0, 0, 1, 1], [], []>} : vector<8x64xf32>, vector<64x128xf32>, vector<8x128xf32> -> vector<8x128xf32>
    %384 = arith.addf %381, %383 : vector<8x128xf32>
    %c0_76 = arith.constant 0 : index
    %c0_77 = arith.constant 0 : index
    %385 = vector.load %arg6[%c0_76, %c0_77] : memref<1x128xf32, #tpu.memory_space<vmem>>, vector<1x128xf32>
    %386 = vector.broadcast %385 : vector<1x128xf32> to vector<8x128xf32>
    %387 = arith.addf %384, %386 : vector<8x128xf32>
    %cst_78 = arith.constant 0.000000e+00 : f32
    %388 = vector.broadcast %cst_78 : f32 to vector<8x128xf32>
    %389 = arith.cmpf ogt, %387, %388 : vector<8x128xf32>
    %cst_79 = arith.constant 0.00999999977 : f32
    %390 = vector.broadcast %cst_79 : f32 to vector<8x128xf32>
    %391 = arith.mulf %390, %387 : vector<8x128xf32>
    %392 = arith.select %389, %387, %391 : vector<8x128xi1>, vector<8x128xf32>
    %c0_80 = arith.constant 0 : index
    %c0_81 = arith.constant 0 : index
    %393 = vector.load %arg7[%c0_80, %c0_81] : memref<128x64xf32, #tpu.memory_space<vmem>>, vector<128x64xf32>
    %cst_82 = arith.constant dense<0.000000e+00> : vector<8x64xf32>
    %394 = tpu.matmul %392, %393, %cst_82 {dimension_numbers = #tpu.dot_dimension_numbers<[1], [0], [0], [1], [0, 0, 1, 1], [], []>} : vector<8x128xf32>, vector<128x64xf32>, vector<8x64xf32> -> vector<8x64xf32>
    %c0_83 = arith.constant 0 : index
    %c0_84 = arith.constant 0 : index
    %395 = vector.load %arg8[%c0_83, %c0_84] : memref<1x64xf32, #tpu.memory_space<vmem>>, vector<1x64xf32>
    %396 = vector.broadcast %395 : vector<1x64xf32> to vector<8x64xf32>
    %397 = arith.addf %394, %396 : vector<8x64xf32>
    %cst_85 = arith.constant 0.000000e+00 : f32
    %398 = vector.broadcast %cst_85 : f32 to vector<8x64xf32>
    %399 = arith.cmpf ogt, %397, %398 : vector<8x64xf32>
    %cst_86 = arith.constant 0.00999999977 : f32
    %400 = vector.broadcast %cst_86 : f32 to vector<8x64xf32>
    %401 = arith.mulf %400, %397 : vector<8x64xf32>
    %402 = arith.select %399, %397, %401 : vector<8x64xi1>, vector<8x64xf32>
    %c0_87 = arith.constant 0 : index
    %c0_88 = arith.constant 0 : index
    %403 = vector.load %arg9[%c0_87, %c0_88] : memref<64x32xf32, #tpu.memory_space<vmem>>, vector<64x32xf32>
    %cst_89 = arith.constant dense<0.000000e+00> : vector<8x32xf32>
    %404 = tpu.matmul %402, %403, %cst_89 {dimension_numbers = #tpu.dot_dimension_numbers<[1], [0], [0], [1], [0, 0, 1, 1], [], []>} : vector<8x64xf32>, vector<64x32xf32>, vector<8x32xf32> -> vector<8x32xf32>
    %c0_90 = arith.constant 0 : index
    %c0_91 = arith.constant 0 : index
    %405 = vector.load %arg10[%c0_90, %c0_91] : memref<1x32xf32, #tpu.memory_space<vmem>>, vector<1x32xf32>
    %406 = vector.broadcast %405 : vector<1x32xf32> to vector<8x32xf32>
    %407 = arith.addf %404, %406 : vector<8x32xf32>
    %cst_92 = arith.constant 0.000000e+00 : f32
    %408 = vector.broadcast %cst_92 : f32 to vector<8x32xf32>
    %409 = arith.cmpf ogt, %407, %408 : vector<8x32xf32>
    %cst_93 = arith.constant 0.00999999977 : f32
    %410 = vector.broadcast %cst_93 : f32 to vector<8x32xf32>
    %411 = arith.mulf %410, %407 : vector<8x32xf32>
    %412 = arith.select %409, %407, %411 : vector<8x32xi1>, vector<8x32xf32>
    %c0_94 = arith.constant 0 : index
    %c0_95 = arith.constant 0 : index
    %413 = vector.load %arg11[%c0_94, %c0_95] : memref<32x16xf32, #tpu.memory_space<vmem>>, vector<32x16xf32>
    %cst_96 = arith.constant dense<0.000000e+00> : vector<8x16xf32>
    %414 = tpu.matmul %412, %413, %cst_96 {dimension_numbers = #tpu.dot_dimension_numbers<[1], [0], [0], [1], [0, 0, 1, 1], [], []>} : vector<8x32xf32>, vector<32x16xf32>, vector<8x16xf32> -> vector<8x16xf32>
    %c0_97 = arith.constant 0 : index
    %c0_98 = arith.constant 0 : index
    %415 = vector.load %arg12[%c0_97, %c0_98] : memref<1x16xf32, #tpu.memory_space<vmem>>, vector<1x16xf32>
    %416 = vector.broadcast %415 : vector<1x16xf32> to vector<8x16xf32>
    %417 = arith.addf %414, %416 : vector<8x16xf32>
    %cst_99 = arith.constant 0.000000e+00 : f32
    %418 = vector.broadcast %cst_99 : f32 to vector<8x16xf32>
    %419 = arith.cmpf ogt, %417, %418 : vector<8x16xf32>
    %cst_100 = arith.constant 0.00999999977 : f32
    %420 = vector.broadcast %cst_100 : f32 to vector<8x16xf32>
    %421 = arith.mulf %420, %417 : vector<8x16xf32>
    %422 = arith.select %419, %417, %421 : vector<8x16xi1>, vector<8x16xf32>
    %c0_101 = arith.constant 0 : index
    %c0_102 = arith.constant 0 : index
    %423 = vector.load %arg13[%c0_101, %c0_102] : memref<16x128xf32, #tpu.memory_space<vmem>>, vector<16x128xf32>
    %cst_103 = arith.constant dense<0.000000e+00> : vector<8x128xf32>
    %424 = tpu.matmul %422, %423, %cst_103 {dimension_numbers = #tpu.dot_dimension_numbers<[1], [0], [0], [1], [0, 0, 1, 1], [], []>} : vector<8x16xf32>, vector<16x128xf32>, vector<8x128xf32> -> vector<8x128xf32>
    %c0_104 = arith.constant 0 : index
    %c0_105 = arith.constant 0 : index
    %425 = vector.load %arg14[%c0_104, %c0_105] : memref<1x128xf32, #tpu.memory_space<vmem>>, vector<1x128xf32>
    %426 = vector.broadcast %425 : vector<1x128xf32> to vector<8x128xf32>
    %427 = arith.addf %424, %426 : vector<8x128xf32>
    %c0_106 = arith.constant 0 : index
    %c0_107 = arith.constant 0 : index
    %428 = vector.load %arg15[%c0_106, %c0_107] : memref<8x128xf32, #tpu.memory_space<vmem>>, vector<8x128xf32>
    tpu.vector_store %arg15[%c0_106, %c0_107], %427 {strides = array<i32>} : memref<8x128xf32, #tpu.memory_space<vmem>>, vector<8x128xf32>,
    return
  }
}

</mosaic_0001>

<bundles_post_ra>
// kernel: gru_critic_forward.1
= control target key start
LH: loop header
LB: loop body
LE: loop exit
PB: predicated region body
PF: predicated region fallthrough
CT: control target
= control target key end

     0   :  { %vm86_vm0 = vcmask 130048   ;;  %v3860_v0 = vmov 0.0|0.0   ;;  %vm3861_vm1 = vmmov 0   ;;  %v3862_v4 = vmov 0.0   ;;  %s3863_s20 = smov 32   ;;  %s3864_s21 = smov 64   ;;  %s4557_s2 = inlined_call_operand.vmem [shape: f32[16,128], index: 2, kind: input, shape index: {}]   ;;  %s4558_s3 = inlined_call_operand.vmem [shape: f32[3,32,128], index: 3, kind: input, shape index: {}]   ;;  %s4559_s0 = inlined_call_operand.vmem [shape: f32[64,16], index: 0, kind: input, shape index: {}]   ;;  %s4560_s4 = inlined_call_operand.vmem [shape: f32[2,1,128], index: 4, kind: input, shape index: {}]   ;;  %s4561_s5 = inlined_call_operand.vmem [shape: f32[96,128], index: 5, kind: input, shape index: {}]   ;;  %s4562_s1 = inlined_call_operand.vmem [shape: f32[8,64], index: 1, kind: input, shape index: {}]   ;;  %s4563_s7 = inlined_call_operand.vmem [shape: f32[128,64], index: 7, kind: input, shape index: {}]   ;;  %s4564_s9 = inlined_call_operand.vmem [shape: f32[64,32], index: 9, kind: input, shape index: {}]   ;;  %s4565_s6 = inlined_call_operand.vmem [shape: f32[1,128], index: 6, kind: input, shape index: {}]   ;;  %s4566_s8 = inlined_call_operand.vmem [shape: f32[1,64], index: 8, kind: input, shape index: {}]   ;;  %s4567_s11 = inlined_call_operand.vmem [shape: f32[32,16], index: 11, kind: input, shape index: {}]   ;;  %s4568_s10 = inlined_call_operand.vmem [shape: f32[1,32], index: 10, kind: input, shape index: {}]   ;;  %s4569_s13 = inlined_call_operand.vmem [shape: f32[16,128], index: 13, kind: input, shape index: {}]   ;;  %s4570_s12 = inlined_call_operand.vmem [shape: f32[1,16], index: 12, kind: input, shape index: {}]   ;;  %s4571_s14 = inlined_call_operand.vmem [shape: f32[1,128], index: 14, kind: input, shape index: {}]   ;;  %s4572_s15 = inlined_call_operand.vmem [shape: f32[8,128], index: 15, kind: output, shape index: {}]  }
   0x1   :  { %3550 = vmatprep.subr.bf16.mxu1 %v3860_v0  ;;  %v78_v1 = vld [vmem:[%s4557_s2] sm:$0xff]  ;;  %v79_v2 = vld [vmem:[%s4557_s2 + $0x8] sm:$0xff]  ;;  %3188 = vmatprep.mubr.msk.f32.mxu1 %vm3861_vm1, %v3862_v4  ;;  %v52_v9 = vld [vmem:[%s4558_s3 + $0x10] sm:$0xff]  ;;  %s3865_s17 = smov 96   ;;  %vm216_vm2 = vcmask 261120   ;;  %vm2407_vm3 = vcmask 523264  }
   0x2   :  { %v50_v3 = vld [vmem:[%s4558_s3] sm:$0xff]  ;;  %v3546_v5 = vpack.c.bf16 %v79_v2, %v78_v1  ;;  %v51_v6 = vld [vmem:[%s4558_s3 + $0x8] sm:$0xff]  ;;  %v53_v10 = vld [vmem:[%s4558_s3 + $0x18] sm:$0xff] }
   0x3   :  { %v70_v7 = vld [vmem:[%s4559_s0] sm:$0xff]  ;;  %v3964_v8 = vpack.c.bf16 %v51_v6, %v50_v3  ;;  %v71_v11 = vld [vmem:[%s4559_s0 + $0x8] sm:$0xff]  ;;  %v3977_v12 = vpack.c.bf16 %v53_v10, %v52_v9  ;;  %v72_v33 = vld [vmem:[%s4559_s0 + $0x10] sm:$0xff] }
   0x4   :  { %3168 = vmatprep.mubr.msk.f32.mxu0 %vm86_vm0, %v70_v7  ;;  %3547 = vmatprep.subr.bf16.mxu0 %v3546_v5  ;;  %v3990_v13 = vld [vmem:[%s4560_s4] ss:$0 sm:$0xff]  ;;  %v55_v29 = vld [vmem:[%s4558_s3 + $0x28] sm:$0xff]  ;;  %v73_v34 = vld [vmem:[%s4559_s0 + $0x18] sm:$0xff] }
   0x5   :  { %3552 = vmatpush3.bf16.msra.mxu1 %v3964_v8  ;;  %3549 = vmatpush3.bf16.msra.mxu0 %v3546_v5  ;;  %v54_v28 = vld [vmem:[%s4558_s3 + $0x20] sm:$0xff]  ;;  %v59_v32 = vld [vmem:[%s4558_s3 + $0x48] sm:$0xff]  ;;  %v60_v36 = vld [vmem:[%s4558_s3 + $0x50] sm:$0xff] }
   0x6   :  { %3553 = vmatprep.subr.bf16.mxu1 %v3860_v0  ;;  %3562 = vmatprep.subr.bf16.mxu0 %v3860_v0  ;;  %v58_v30 = vld [vmem:[%s4558_s3 + $0x40] sm:$0xff]  ;;  %v4006_v31 = vpack.c.bf16 %v55_v29, %v54_v28  ;;  %v61_v37 = vld [vmem:[%s4558_s3 + $0x58] sm:$0xff]  ;;  %v56_v39 = vld [vmem:[%s4558_s3 + $0x30] sm:$0xff] }
   0x7   :  { %v4017_v35 = vpack.c.bf16 %v59_v32, %v58_v30  ;;  %v74_v38 = vld [vmem:[%s4559_s0 + $0x20] sm:$0xff]  ;;  %v57_v40 = vld [vmem:[%s4558_s3 + $0x38] sm:$0xff]  ;;  %v4038_v41 = vpack.c.bf16 %v61_v37, %v60_v36  ;;  %v75_v43 = vld [vmem:[%s4559_s0 + $0x28] sm:$0xff] }
   0x8   :  { %3169 = vmatmul.mubr.msk.f32.vlgmr.msra.gmra.mrb[0].mxu0 %vm86_vm0, %v71_v11  ;;  %v4040_v42 = vpack.c.bf16 %v57_v40, %v56_v39  ;;  %v76_v44 = vld [vmem:[%s4559_s0 + $0x30] sm:$0xff]  ;;  %v77_v46 = vld [vmem:[%s4559_s0 + $0x38] sm:$0xff]  ;;  %v4106_v62 = vld [vmem:[%s4560_s4 + $0x1] ss:$0 sm:$0xff] }
   0x9   :  { %3555 = vmatpush3.bf16.msra.mxu1 %v3977_v12  ;;  %3171 = vmatprep.mubr.msk.f32.mxu0 %vm86_vm0, %v72_v33 }
   0xa   :  { %3556 = vmatprep.subr.bf16.mxu1 %v3860_v0  ;;  %3564 = vmatpush3.bf16.msra.mxu0 %v4006_v31 }
   0xb   :  { %3565 = vmatprep.subr.bf16.mxu0 %v3860_v0 }
   0xc   :  { %3189 = vmatmul.mubr.f32.vlgmr.msra.gmra.mrb[0].mxu1 %v3862_v4  ;;  %3172 = vmatmul.mubr.msk.f32.gmra.mrb[2].mxu0 %vm86_vm0, %v73_v34 }
   0xd   :  { %3199 = vmatprep.mubr.msk.f32.mxu1 %vm3861_vm1, %v3862_v4  ;;  %3558 = vmatpush3.bf16.msra.mxu1 %v4017_v35 }
   0xe   :  { %3559 = vmatprep.subr.bf16.mxu1 %v3860_v0  ;;  %3174 = vmatprep.mubr.msk.f32.mxu0 %vm86_vm0, %v74_v38 }
   0xf   :  { %3567 = vmatpush3.bf16.msra.mxu0 %v4040_v42 }
  0x10   :  { %3175 = vmatmul.mubr.msk.f32.gmra.mrb[4].mxu0 %vm86_vm0, %v75_v43  ;;  %3574 = vmatprep.subr.bf16.mxu0 %v3860_v0 }
  0x11   :  { %3561 = vmatpush3.bf16.msra.mxu1 %v4038_v41  ;;  %3177 = vmatprep.mubr.msk.f32.mxu0 %vm86_vm0, %v76_v44 }
  0x12   :  { %3568 = vmatprep.subr.bf16.mxu1 %v3860_v0 }
  0x14   :  { %3200 = vmatmul.mubr.f32.vlgmr.msra.gmra.mrb[2].mxu1 %v3862_v4  ;;  %3178 = vmatmul.mubr.msk.f32.gmra.mrb[6].mxu0 %vm86_vm0, %v77_v46 }
  0x15   :  { %3570 = vmatpush3.bf16.msra.mxu1 %v3964_v8  ;;  %3210 = vmatprep.mubr.msk.f32.mxu0 %vm3861_vm1, %v3862_v4 }
  0x16   :  { %3571 = vmatprep.subr.bf16.mxu1 %v3860_v0  ;;  %3221 = vmatprep.mubr.msk.f32.mxu1 %vm3861_vm1, %v3862_v4 }
  0x19   :  { %3573 = vmatpush3.bf16.msra.mxu1 %v3977_v12 }
  0x1a   :  { %3580 = vmatprep.subr.bf16.mxu1 %v3860_v0 }
  0xdb   :  { %v3992_v14 = vpop.f32.mrb[0].mxu0 }
  0xdc   :  { %v177_v15 = vpop.f32.mrb[1].mxu0  ;;  %v183_v61 = vadd.f32 %v3992_v14, %v3990_v13 }
  0xdd   :  { %v178_v16 = vadd.f32 %v3990_v13, %v177_v15 }
  0xdf   :  { %v286_v17 = vpop.f32.mrb[0].mxu1  ;;  %v4075_v52 = vpop.f32.mrb[2].mxu0 }
  0xe0   :  { %v290_v18 = vadd.f32 %v286_v17, %v178_v16  ;;  %v3190_v19 = vpop.f32.mrb[1].mxu1  ;;  %v4077_v53 = vpop.f32.mrb[3].mxu0 }
  0xe2   :  { %298 = vrot.lane.b32.xlu0 %v290_v18, %s3863_s20  ;;  %v2938_v20 = vmul.f32 -1.442695, %v290_v18 }
  0xe3   :  { %v4079_v54 = vpop.f32.mrb[4].mxu0 }
  0xe4   :  { %3763 = vpow2.f32 %v2938_v20  ;;  %v4081_v55 = vpop.f32.mrb[5].mxu0 }
  0xe7   :  { %v382_v56 = vpop.f32.mrb[2].mxu1  ;;  %v4083_v57 = vpop.f32.mrb[6].mxu0 }
  0xe8   :  { %v3201_v58 = vpop.f32.mrb[3].mxu1  ;;  %v4085_v59 = vpop.f32.mrb[7].mxu0 }
  0xee   :  { %v3764_v21 = vpop.eup %3763 }
  0xef   :  { %v294_v22 = vadd.f32 1.0, %v3764_v21 }
  0xf1   :  { %3765 = vrcp.f32 %v294_v22 }
  0xfb   :  { %v3766_v23 = vpop.eup %3765 }
  0xfc   :  { %v308_v47 = vsub.f32 1.0, %v3766_v23  ;;  %v314_v49 = vmul.f32 0.0, %v3766_v23 }
 0x154   :  { %v299_v24 = vpop.permute.xlu0 %298 }
 0x155   :  { %v301_v25 = vmul.f32 %v3766_v23, %v299_v24 }
 0x157   :  { %303 = vrot.lane.b32.xlu0 %v301_v25, %s3864_s21 }
 0x1c9   :  { %v304_v26 = vpop.permute.xlu0 %303 }
 0x1ca   :  { %v306_v27 = vadd.f32 %v304_v26, %v290_v18 }
 0x1cc   :  { %3767 = vtanh.f32 %v306_v27 }
 0x1d6   :  { %v3768_v45 = vpop.eup %3767 }
 0x1d7   :  { %310 = vrot.lane.b32.xlu1 %v3768_v45, %s3865_s17 }
 0x249   :  { %v311_v48 = vpop.permute.xlu1 %310 }
 0x24a   :  { %v313_v50 = vmul.f32 %v311_v48, %v308_v47 }
 0x24c   :  { %v4071_v51 = vadd.f32 %v314_v49, %v313_v50 }
 0x24e   :  { %387 = vrot.lane.b32.xlu1 %v4071_v51, %s3865_s17 }
 0x2c0   :  { %v388_v60 = vpop.permute.xlu1 %387 }
 0x2c1   :  { %3211 = vmatmul.mubr.msk.f32.vlgmr.msra.gmra.mrb[8].mxu0 %vm216_vm2, %v388_v60  ;;  %3222 = vmatmul.mubr.msk.f32.vlgmr.msra.gmra.mrb[4].mxu1 %vm216_vm2, %v388_v60 }
 0x2c2   :  { %3582 = vmatpush3.bf16.msra.mxu1 %v4006_v31  ;;  %3576 = vmatpush3.bf16.msra.mxu0 %v4017_v35 }
 0x2c3   :  { %3583 = vmatprep.subr.bf16.mxu1 %v3860_v0  ;;  %3577 = vmatprep.subr.bf16.mxu0 %v3860_v0 }
 0x2c4   :  { %3243 = vmatprep.mubr.msk.f32.mxu1 %vm3861_vm1, %v3862_v4  ;;  %3232 = vmatprep.mubr.msk.f32.mxu0 %vm3861_vm1, %v3862_v4 }
 0x2c6   :  { %3585 = vmatpush3.bf16.msra.mxu1 %v4040_v42  ;;  %3579 = vmatpush3.bf16.msra.mxu0 %v4038_v41 }
 0x2c7   :  { %3586 = vmatprep.subr.bf16.mxu0 %v3860_v0  ;;  %3592 = vmatprep.subr.bf16.mxu1 %v3860_v0 }
 0x394   :  { %v457_v63 = vpop.f32.mrb[8].mxu0  ;;  %v553_v1 = vpop.f32.mrb[4].mxu1 }
 0x395   :  { %v458_v2 = vadd.f32 %v457_v63, %v382_v56  ;;  %v557_v3 = vadd.f32 %v553_v1, %v183_v61  ;;  %v3212_v5 = vpop.f32.mrb[9].mxu0  ;;  %v3223_v6 = vpop.f32.mrb[5].mxu1 }
 0x397   :  { %v461_v7 = vadd.f32 %v4106_v62, %v458_v2  ;;  %565 = vrot.lane.b32.xlu1 %v557_v3, %s3863_s20  ;;  %v2942_v9 = vmul.f32 -1.442695, %v557_v3 }
 0x399   :  { %469 = vrot.lane.b32.xlu0 %v461_v7, %s3863_s20  ;;  %v2940_v10 = vmul.f32 -1.442695, %v461_v7  ;;  %3769 = vpow2.f32 %v2942_v9 }
 0x39b   :  { %3771 = vpow2.f32 %v2940_v10 }
 0x3a3   :  { %v3770_v11 = vpop.eup %3769 }
 0x3a4   :  { %v561_v15 = vadd.f32 1.0, %v3770_v11 }
 0x3a5   :  { %v3772_v14 = vpop.eup %3771 }
 0x3a6   :  { %v465_v16 = vadd.f32 1.0, %v3772_v14  ;;  %3773 = vrcp.f32 %v561_v15 }
 0x3a8   :  { %3775 = vrcp.f32 %v465_v16 }
 0x3b0   :  { %v3774_v17 = vpop.eup %3773 }
 0x3b1   :  { %v575_v29 = vsub.f32 1.0, %v3774_v17  ;;  %v581_v32 = vmul.f32 %v3774_v17, %v4071_v51  ;;  %v188_v51 = vadd.f32 %v3990_v13, %v4077_v53 }
 0x3b2   :  { %v3776_v20 = vpop.eup %3775 }
 0x3b3   :  { %v479_v34 = vsub.f32 1.0, %v3776_v20  ;;  %v485_v38 = vmul.f32 0.0, %v3776_v20 }
 0x409   :  { %v566_v18 = vpop.permute.xlu1 %565 }
 0x40a   :  { %v568_v19 = vmul.f32 %v3774_v17, %v566_v18 }
 0x40b   :  { %v470_v21 = vpop.permute.xlu0 %469 }
 0x40c   :  { %v472_v22 = vmul.f32 %v3776_v20, %v470_v21  ;;  %570 = vrot.lane.b32.xlu1 %v568_v19, %s3864_s21 }
 0x40e   :  { %474 = vrot.lane.b32.xlu0 %v472_v22, %s3864_s21 }
 0x47e   :  { %v571_v23 = vpop.permute.xlu1 %570 }
 0x47f   :  { %v573_v24 = vadd.f32 %v571_v23, %v557_v3 }
 0x480   :  { %v475_v25 = vpop.permute.xlu0 %474 }
 0x481   :  { %3777 = vtanh.f32 %v573_v24  ;;  %v477_v26 = vadd.f32 %v475_v25, %v461_v7 }
 0x483   :  { %3779 = vtanh.f32 %v477_v26 }
 0x48b   :  { %v3778_v27 = vpop.eup %3777 }
 0x48c   :  { %577 = vrot.lane.b32.xlu1 %v3778_v27, %s3865_s17 }
 0x48d   :  { %v3780_v28 = vpop.eup %3779 }
 0x48e   :  { %481 = vrot.lane.b32.xlu0 %v3780_v28, %s3865_s17 }
 0x4fe   :  { %v578_v30 = vpop.permute.xlu1 %577 }
 0x4ff   :  { %v580_v33 = vmul.f32 %v578_v30, %v575_v29 }
 0x500   :  { %v482_v36 = vpop.permute.xlu0 %481 }
 0x501   :  { %v4116_v37 = vadd.f32 %v581_v32, %v580_v33  ;;  %v484_v39 = vmul.f32 %v482_v36, %v479_v34 }
 0x503   :  { %v4118_v40 = vadd.f32 %v485_v38, %v484_v39  ;;  %659 = vrot.lane.b32.xlu1 %v4116_v37, %s3865_s17 }
 0x505   :  { %584 = vrot.lane.b32.xlu0 %v4118_v40, %s3865_s17 }
 0x575   :  { %v660_v43 = vpop.permute.xlu1 %659 }
 0x576   :  { %3244 = vmatmul.mubr.msk.f32.vlgmr.msra.gmra.mrb[6].mxu1 %vm216_vm2, %v660_v43 }
 0x577   :  { %v585_v44 = vpop.permute.xlu0 %584  ;;  %3594 = vmatpush3.bf16.msra.mxu1 %v4017_v35  ;;  %3265 = vmatprep.mubr.msk.f32.mxu1 %vm3861_vm1, %v3862_v4 }
 0x578   :  { %3233 = vmatmul.mubr.msk.f32.vlgmr.msra.gmra.mrb[10].mxu0 %vm216_vm2, %v585_v44  ;;  %3595 = vmatprep.subr.bf16.mxu1 %v3860_v0 }
 0x579   :  { %3588 = vmatpush3.bf16.msra.mxu0 %v3964_v8  ;;  %3254 = vmatprep.mubr.msk.f32.mxu0 %vm3861_vm1, %v3862_v4 }
 0x57a   :  { %3589 = vmatprep.subr.bf16.mxu0 %v3860_v0 }
 0x57b   :  { %3597 = vmatpush3.bf16.msra.mxu1 %v4038_v41 }
 0x57c   :  { %3604 = vmatprep.subr.bf16.mxu1 %v3860_v0 }
 0x57d   :  { %3591 = vmatpush3.bf16.msra.mxu0 %v3977_v12 }
 0x57e   :  { %3598 = vmatprep.subr.bf16.mxu0 %v3860_v0 }
 0x580   :  { %3255 = vmatmul.mubr.msk.f32.vlgmr.msra.gmra.mrb[12].mxu0 %vm216_vm2, %v660_v43 }
 0x581   :  { %3600 = vmatpush3.bf16.msra.mxu0 %v4006_v31  ;;  %3276 = vmatprep.mubr.msk.f32.mxu0 %vm3861_vm1, %v3862_v4 }
 0x582   :  { %3601 = vmatprep.subr.bf16.mxu0 %v3860_v0 }
 0x585   :  { %3603 = vmatpush3.bf16.msra.mxu0 %v4040_v42 }
 0x586   :  { %3610 = vmatprep.subr.bf16.mxu0 %v3860_v0 }
 0x649   :  { %v729_v45 = vpop.f32.mrb[6].mxu1 }
 0x64a   :  { %v3245_v46 = vpop.f32.mrb[7].mxu1 }
 0x64b   :  { %v654_v47 = vpop.f32.mrb[10].mxu0 }
 0x64c   :  { %v730_v48 = vadd.f32 %v729_v45, %v654_v47  ;;  %v3234_v49 = vpop.f32.mrb[11].mxu0 }
 0x64e   :  { %v733_v50 = vadd.f32 %v4106_v62, %v730_v48 }
 0x650   :  { %741 = vrot.lane.b32.xlu0 %v733_v50, %s3863_s20  ;;  %v2945_v61 = vmul.f32 -1.442695, %v733_v50 }
 0x652   :  { %3781 = vpow2.f32 %v2945_v61 }
 0x653   :  { %v825_v56 = vpop.f32.mrb[12].mxu0 }
 0x654   :  { %v829_v58 = vadd.f32 %v825_v56, %v188_v51  ;;  %v3256_v60 = vpop.f32.mrb[13].mxu0 }
 0x656   :  { %837 = vrot.lane.b32.xlu1 %v829_v58, %s3863_s20  ;;  %v2947_v63 = vmul.f32 -1.442695, %v829_v58 }
 0x658   :  { %3783 = vpow2.f32 %v2947_v63 }
 0x65c   :  { %v3782_v1 = vpop.eup %3781 }
 0x65d   :  { %v737_v2 = vadd.f32 1.0, %v3782_v1 }
 0x65f   :  { %3785 = vrcp.f32 %v737_v2 }
 0x662   :  { %v3784_v3 = vpop.eup %3783 }
 0x663   :  { %v833_v5 = vadd.f32 1.0, %v3784_v3 }
 0x665   :  { %3787 = vrcp.f32 %v833_v5 }
 0x669   :  { %v3786_v6 = vpop.eup %3785 }
 0x66a   :  { %v751_v20 = vsub.f32 1.0, %v3786_v6  ;;  %v757_v22 = vmul.f32 %v3786_v6, %v4118_v40 }
 0x66f   :  { %v3788_v53 = vpop.eup %3787 }
 0x670   :  { %v847_v25 = vsub.f32 1.0, %v3788_v53  ;;  %v853_v27 = vmul.f32 %v3788_v53, %v4116_v37  ;;  %v193_v37 = vadd.f32 %v4075_v52, %v3990_v13 }
 0x6c2   :  { %v742_v7 = vpop.permute.xlu0 %741 }
 0x6c3   :  { %v744_v9 = vmul.f32 %v3786_v6, %v742_v7 }
 0x6c5   :  { %746 = vrot.lane.b32.xlu0 %v744_v9, %s3864_s21 }
 0x6c8   :  { %v838_v10 = vpop.permute.xlu1 %837 }
 0x6c9   :  { %v840_v11 = vmul.f32 %v3788_v53, %v838_v10 }
 0x6cb   :  { %842 = vrot.lane.b32.xlu1 %v840_v11, %s3864_s21 }
 0x737   :  { %v747_v14 = vpop.permute.xlu0 %746 }
 0x738   :  { %v749_v15 = vadd.f32 %v747_v14, %v733_v50 }
 0x73a   :  { %3789 = vtanh.f32 %v749_v15 }
 0x73d   :  { %v843_v16 = vpop.permute.xlu1 %842 }
 0x73e   :  { %v845_v17 = vadd.f32 %v843_v16, %v829_v58 }
 0x740   :  { %3791 = vtanh.f32 %v845_v17 }
 0x744   :  { %v3790_v18 = vpop.eup %3789 }
 0x745   :  { %753 = vrot.lane.b32.xlu0 %v3790_v18, %s3865_s17 }
 0x74a   :  { %v3792_v19 = vpop.eup %3791 }
 0x74b   :  { %849 = vrot.lane.b32.xlu1 %v3792_v19, %s3865_s17 }
 0x7b7   :  { %v754_v21 = vpop.permute.xlu0 %753 }
 0x7b8   :  { %v756_v23 = vmul.f32 %v754_v21, %v751_v20 }
 0x7ba   :  { %v4155_v24 = vadd.f32 %v757_v22, %v756_v23 }
 0x7bc   :  { %856 = vrot.lane.b32.xlu0 %v4155_v24, %s3865_s17 }
 0x7bd   :  { %v850_v26 = vpop.permute.xlu1 %849 }
 0x7be   :  { %v852_v28 = vmul.f32 %v850_v26, %v847_v25 }
 0x7c0   :  { %v4160_v29 = vadd.f32 %v853_v27, %v852_v28  ;;  %v198_v28 = vadd.f32 %v3990_v13, %v4081_v55 }
 0x7c2   :  { %931 = vrot.lane.b32.xlu1 %v4160_v29, %s3865_s17 }
 0x82e   :  { %v857_v30 = vpop.permute.xlu0 %856 }
 0x82f   :  { %3266 = vmatmul.mubr.msk.f32.vlgmr.msra.gmra.mrb[8].mxu1 %vm216_vm2, %v857_v30 }
 0x830   :  { %3606 = vmatpush3.bf16.msra.mxu1 %v3964_v8  ;;  %3287 = vmatprep.mubr.msk.f32.mxu1 %vm3861_vm1, %v3862_v4 }
 0x831   :  { %3607 = vmatprep.subr.bf16.mxu1 %v3860_v0 }
 0x834   :  { %3609 = vmatpush3.bf16.msra.mxu1 %v3977_v12  ;;  %v932_v32 = vpop.permute.xlu1 %931 }
 0x835   :  { %3277 = vmatmul.mubr.msk.f32.vlgmr.msra.gmra.mrb[14].mxu0 %vm216_vm2, %v932_v32  ;;  %3616 = vmatprep.subr.bf16.mxu1 %v3860_v0 }
 0x836   :  { %3612 = vmatpush3.bf16.msra.mxu0 %v4017_v35  ;;  %3298 = vmatprep.mubr.msk.f32.mxu0 %vm3861_vm1, %v3862_v4 }
 0x837   :  { %3288 = vmatmul.mubr.msk.f32.vlgmr.msra.gmra.mrb[10].mxu1 %vm216_vm2, %v932_v32  ;;  %3613 = vmatprep.subr.bf16.mxu0 %v3860_v0 }
 0x838   :  { %3618 = vmatpush3.bf16.msra.mxu1 %v4006_v31  ;;  %3309 = vmatprep.mubr.msk.f32.mxu1 %vm3861_vm1, %v3862_v4 }
 0x839   :  { %3619 = vmatprep.subr.bf16.mxu1 %v3860_v0 }
 0x83a   :  { %3615 = vmatpush3.bf16.msra.mxu0 %v4038_v41 }
 0x83b   :  { %3622 = vmatprep.subr.bf16.mxu0 %v3860_v0 }
 0x83c   :  { %3621 = vmatpush3.bf16.msra.mxu1 %v4040_v42 }
 0x83d   :  { %3628 = vmatprep.subr.bf16.mxu1 %v3860_v0 }
 0x902   :  { %v926_v33 = vpop.f32.mrb[8].mxu1 }
 0x903   :  { %v3267_v34 = vpop.f32.mrb[9].mxu1 }
 0x908   :  { %v1001_v36 = vpop.f32.mrb[14].mxu0 }
 0x909   :  { %v1002_v38 = vadd.f32 %v1001_v36, %v926_v33  ;;  %v3278_v39 = vpop.f32.mrb[15].mxu0 }
 0x90a   :  { %v1097_v40 = vpop.f32.mrb[10].mxu1 }
 0x90b   :  { %v1005_v43 = vadd.f32 %v4106_v62, %v1002_v38  ;;  %v1101_v44 = vadd.f32 %v1097_v40, %v193_v37  ;;  %v3289_v45 = vpop.f32.mrb[11].mxu1 }
 0x90d   :  { %1109 = vrot.lane.b32.xlu1 %v1101_v44, %s3863_s20  ;;  %1013 = vrot.lane.b32.xlu0 %v1005_v43, %s3863_s20  ;;  %v2950_v46 = vmul.f32 -1.442695, %v1005_v43  ;;  %v2952_v47 = vmul.f32 -1.442695, %v1101_v44 }
 0x90f   :  { %3793 = vpow2.f32 %v2950_v46 }
 0x910   :  { %3795 = vpow2.f32 %v2952_v47 }
 0x919   :  { %v3794_v48 = vpop.eup %3793 }
 0x91a   :  { %v3796_v49 = vpop.eup %3795  ;;  %v1009_v50 = vadd.f32 1.0, %v3794_v48 }
 0x91b   :  { %v1105_v51 = vadd.f32 1.0, %v3796_v49 }
 0x91c   :  { %3797 = vrcp.f32 %v1009_v50 }
 0x91d   :  { %3799 = vrcp.f32 %v1105_v51 }
 0x926   :  { %v3798_v52 = vpop.eup %3797 }
 0x927   :  { %v3800_v56 = vpop.eup %3799  ;;  %v1023_v10 = vsub.f32 1.0, %v3798_v52  ;;  %v1029_v16 = vmul.f32 %v3798_v52, %v4155_v24 }
 0x928   :  { %v1119_v9 = vsub.f32 1.0, %v3800_v56  ;;  %v1125_v11 = vmul.f32 %v3800_v56, %v4160_v29 }
 0x97f   :  { %v1110_v58 = vpop.permute.xlu1 %1109  ;;  %v1014_v60 = vpop.permute.xlu0 %1013 }
 0x980   :  { %v1112_v61 = vmul.f32 %v3800_v56, %v1110_v58  ;;  %v1016_v63 = vmul.f32 %v3798_v52, %v1014_v60 }
 0x982   :  { %1114 = vrot.lane.b32.xlu1 %v1112_v61, %s3864_s21  ;;  %1018 = vrot.lane.b32.xlu0 %v1016_v63, %s3864_s21 }
 0x9f4   :  { %v1115_v1 = vpop.permute.xlu1 %1114  ;;  %v1019_v2 = vpop.permute.xlu0 %1018 }
 0x9f5   :  { %v1117_v3 = vadd.f32 %v1115_v1, %v1101_v44  ;;  %v1021_v5 = vadd.f32 %v1019_v2, %v1005_v43 }
 0x9f7   :  { %3801 = vtanh.f32 %v1117_v3 }
 0x9f8   :  { %3803 = vtanh.f32 %v1021_v5 }
 0xa01   :  { %v3802_v6 = vpop.eup %3801 }
 0xa02   :  { %v3804_v7 = vpop.eup %3803  ;;  %1121 = vrot.lane.b32.xlu1 %v3802_v6, %s3865_s17 }
 0xa03   :  { %1025 = vrot.lane.b32.xlu0 %v3804_v7, %s3865_s17 }
 0xa74   :  { %v1122_v53 = vpop.permute.xlu1 %1121 }
 0xa75   :  { %v1124_v14 = vmul.f32 %v1122_v53, %v1119_v9  ;;  %v1026_v15 = vpop.permute.xlu0 %1025 }
 0xa76   :  { %v1028_v17 = vmul.f32 %v1026_v15, %v1023_v10 }
 0xa77   :  { %v4196_v18 = vadd.f32 %v1125_v11, %v1124_v14  ;;  %v203_v14 = vadd.f32 %v4079_v54, %v3990_v13 }
 0xa78   :  { %v4198_v19 = vadd.f32 %v1029_v16, %v1028_v17 }
 0xa79   :  { %1203 = vrot.lane.b32.xlu1 %v4196_v18, %s3865_s17 }
 0xa7a   :  { %1128 = vrot.lane.b32.xlu0 %v4198_v19, %s3865_s17 }
 0xaeb   :  { %v1204_v20 = vpop.permute.xlu1 %1203 }
 0xaec   :  { %v1129_v21 = vpop.permute.xlu0 %1128  ;;  %3310 = vmatmul.mubr.msk.f32.vlgmr.msra.gmra.mrb[12].mxu1 %vm216_vm2, %v1204_v20 }
 0xaed   :  { %3299 = vmatmul.mubr.msk.f32.vlgmr.msra.gmra.mrb[16].mxu0 %vm216_vm2, %v1129_v21  ;;  %3630 = vmatpush3.bf16.msra.mxu1 %v4017_v35 }
 0xaee   :  { %3624 = vmatpush3.bf16.msra.mxu0 %v3964_v8  ;;  %3320 = vmatprep.mubr.msk.f32.mxu0 %vm3861_vm1, %v3862_v4 }
 0xaef   :  { %3625 = vmatprep.subr.bf16.mxu0 %v3860_v0  ;;  %3631 = vmatprep.subr.bf16.mxu1 %v3860_v0 }
 0xaf0   :  { %3331 = vmatprep.mubr.msk.f32.mxu1 %vm3861_vm1, %v3862_v4 }
 0xaf1   :  { %3633 = vmatpush3.bf16.msra.mxu1 %v4038_v41 }
 0xaf2   :  { %3627 = vmatpush3.bf16.msra.mxu0 %v3977_v12  ;;  %3640 = vmatprep.subr.bf16.mxu1 %v3860_v0 }
 0xaf3   :  { %3634 = vmatprep.subr.bf16.mxu0 %v3860_v0 }
 0xaf5   :  { %3321 = vmatmul.mubr.msk.f32.vlgmr.msra.gmra.mrb[18].mxu0 %vm216_vm2, %v1204_v20 }
 0xaf6   :  { %3636 = vmatpush3.bf16.msra.mxu0 %v4006_v31  ;;  %3342 = vmatprep.mubr.msk.f32.mxu0 %vm3861_vm1, %v3862_v4 }
 0xaf7   :  { %3637 = vmatprep.subr.bf16.mxu0 %v3860_v0 }
 0xafa   :  { %3639 = vmatpush3.bf16.msra.mxu0 %v4040_v42 }
 0xafb   :  { %3646 = vmatprep.subr.bf16.mxu0 %v3860_v0 }
 0xbbf   :  { %v1273_v22 = vpop.f32.mrb[12].mxu1 }
 0xbc0   :  { %v1198_v23 = vpop.f32.mrb[16].mxu0  ;;  %v3311_v24 = vpop.f32.mrb[13].mxu1 }
 0xbc1   :  { %v1274_v25 = vadd.f32 %v1273_v22, %v1198_v23  ;;  %v3300_v26 = vpop.f32.mrb[17].mxu0 }
 0xbc3   :  { %v1277_v27 = vadd.f32 %v4106_v62, %v1274_v25 }
 0xbc5   :  { %1285 = vrot.lane.b32.xlu0 %v1277_v27, %s3863_s20  ;;  %v2955_v33 = vmul.f32 -1.442695, %v1277_v27 }
 0xbc7   :  { %3805 = vpow2.f32 %v2955_v33 }
 0xbc8   :  { %v1369_v29 = vpop.f32.mrb[18].mxu0 }
 0xbc9   :  { %v1373_v30 = vadd.f32 %v1369_v29, %v198_v28  ;;  %v3322_v32 = vpop.f32.mrb[19].mxu0 }
 0xbcb   :  { %1381 = vrot.lane.b32.xlu1 %v1373_v30, %s3863_s20  ;;  %v2957_v34 = vmul.f32 -1.442695, %v1373_v30 }
 0xbcd   :  { %3807 = vpow2.f32 %v2957_v34 }
 0xbd1   :  { %v3806_v36 = vpop.eup %3805 }
 0xbd2   :  { %v1281_v37 = vadd.f32 1.0, %v3806_v36 }
 0xbd4   :  { %3809 = vrcp.f32 %v1281_v37 }
 0xbd7   :  { %v3808_v38 = vpop.eup %3807 }
 0xbd8   :  { %v1377_v39 = vadd.f32 1.0, %v3808_v38 }
 0xbda   :  { %3811 = vrcp.f32 %v1377_v39 }
 0xbde   :  { %v3810_v40 = vpop.eup %3809 }
 0xbdf   :  { %v1295_v56 = vsub.f32 1.0, %v3810_v40  ;;  %v1301_v60 = vmul.f32 %v3810_v40, %v4198_v19 }
 0xbe4   :  { %v3812_v55 = vpop.eup %3811 }
 0xbe5   :  { %v1391_v1 = vsub.f32 1.0, %v3812_v55  ;;  %v1397_v3 = vmul.f32 %v3812_v55, %v4196_v18 }
 0xc37   :  { %v1286_v43 = vpop.permute.xlu0 %1285 }
 0xc38   :  { %v1288_v44 = vmul.f32 %v3810_v40, %v1286_v43 }
 0xc3a   :  { %1290 = vrot.lane.b32.xlu0 %v1288_v44, %s3864_s21 }
 0xc3d   :  { %v1382_v45 = vpop.permute.xlu1 %1381 }
 0xc3e   :  { %v1384_v46 = vmul.f32 %v3812_v55, %v1382_v45 }
 0xc40   :  { %1386 = vrot.lane.b32.xlu1 %v1384_v46, %s3864_s21 }
 0xcac   :  { %v1291_v47 = vpop.permute.xlu0 %1290 }
 0xcad   :  { %v1293_v48 = vadd.f32 %v1291_v47, %v1277_v27 }
 0xcaf   :  { %3813 = vtanh.f32 %v1293_v48 }
 0xcb2   :  { %v1387_v49 = vpop.permute.xlu1 %1386 }
 0xcb3   :  { %v1389_v50 = vadd.f32 %v1387_v49, %v1373_v30 }
 0xcb5   :  { %3815 = vtanh.f32 %v1389_v50 }
 0xcb9   :  { %v3814_v51 = vpop.eup %3813 }
 0xcba   :  { %1297 = vrot.lane.b32.xlu0 %v3814_v51, %s3865_s17 }
 0xcbf   :  { %v3816_v52 = vpop.eup %3815 }
 0xcc0   :  { %1393 = vrot.lane.b32.xlu1 %v3816_v52, %s3865_s17 }
 0xd2c   :  { %v1298_v58 = vpop.permute.xlu0 %1297 }
 0xd2d   :  { %v1300_v61 = vmul.f32 %v1298_v58, %v1295_v56 }
 0xd2f   :  { %v4235_v63 = vadd.f32 %v1301_v60, %v1300_v61 }
 0xd31   :  { %1400 = vrot.lane.b32.xlu0 %v4235_v63, %s3865_s17 }
 0xd32   :  { %v1394_v2 = vpop.permute.xlu1 %1393 }
 0xd33   :  { %v1396_v5 = vmul.f32 %v1394_v2, %v1391_v1  ;;  %v208_v2 = vadd.f32 %v3990_v13, %v4085_v59 }
 0xd35   :  { %v4240_v6 = vadd.f32 %v1397_v3, %v1396_v5 }
 0xd37   :  { %1475 = vrot.lane.b32.xlu1 %v4240_v6, %s3865_s17 }
 0xda3   :  { %v1401_v7 = vpop.permute.xlu0 %1400 }
 0xda4   :  { %3332 = vmatmul.mubr.msk.f32.vlgmr.msra.gmra.mrb[14].mxu1 %vm216_vm2, %v1401_v7 }
 0xda5   :  { %3642 = vmatpush3.bf16.msra.mxu1 %v3964_v8  ;;  %3353 = vmatprep.mubr.msk.f32.mxu1 %vm3861_vm1, %v3862_v4 }
 0xda6   :  { %3643 = vmatprep.subr.bf16.mxu1 %v3860_v0 }
 0xda9   :  { %3645 = vmatpush3.bf16.msra.mxu1 %v3977_v12  ;;  %v1476_v9 = vpop.permute.xlu1 %1475 }
 0xdaa   :  { %3343 = vmatmul.mubr.msk.f32.vlgmr.msra.gmra.mrb[20].mxu0 %vm216_vm2, %v1476_v9  ;;  %3652 = vmatprep.subr.bf16.mxu1 %v3860_v0 }
 0xdab   :  { %3648 = vmatpush3.bf16.msra.mxu0 %v4017_v35  ;;  %3364 = vmatprep.mubr.msk.f32.mxu0 %vm3861_vm1, %v3862_v4 }
 0xdac   :  { %3354 = vmatmul.mubr.msk.f32.vlgmr.msra.gmra.mrb[16].mxu1 %vm216_vm2, %v1476_v9  ;;  %3649 = vmatprep.subr.bf16.mxu0 %v3860_v0 }
 0xdad   :  { %3654 = vmatpush3.bf16.msra.mxu1 %v4006_v31  ;;  %3375 = vmatprep.mubr.msk.f32.mxu1 %vm3861_vm1, %v3862_v4 }
 0xdae   :  { %3655 = vmatprep.subr.bf16.mxu1 %v3860_v0 }
 0xdaf   :  { %3651 = vmatpush3.bf16.msra.mxu0 %v4038_v41 }
 0xdb0   :  { %3658 = vmatprep.subr.bf16.mxu0 %v3860_v0 }
 0xdb1   :  { %3657 = vmatpush3.bf16.msra.mxu1 %v4040_v42 }
 0xdb2   :  { %3664 = vmatprep.subr.bf16.mxu1 %v3860_v0 }
 0xe77   :  { %v1470_v53 = vpop.f32.mrb[14].mxu1 }
 0xe78   :  { %v3333_v10 = vpop.f32.mrb[15].mxu1 }
 0xe7d   :  { %v1545_v11 = vpop.f32.mrb[20].mxu0 }
 0xe7e   :  { %v1546_v15 = vadd.f32 %v1545_v11, %v1470_v53  ;;  %v3344_v16 = vpop.f32.mrb[21].mxu0 }
 0xe7f   :  { %v1641_v17 = vpop.f32.mrb[16].mxu1 }
 0xe80   :  { %v1549_v18 = vadd.f32 %v4106_v62, %v1546_v15  ;;  %v1645_v19 = vadd.f32 %v1641_v17, %v203_v14  ;;  %v3355_v20 = vpop.f32.mrb[17].mxu1 }
 0xe82   :  { %1653 = vrot.lane.b32.xlu1 %v1645_v19, %s3863_s20  ;;  %1557 = vrot.lane.b32.xlu0 %v1549_v18, %s3863_s20  ;;  %v2960_v21 = vmul.f32 -1.442695, %v1549_v18  ;;  %v2962_v22 = vmul.f32 -1.442695, %v1645_v19 }
 0xe84   :  { %3817 = vpow2.f32 %v2960_v21 }
 0xe85   :  { %3819 = vpow2.f32 %v2962_v22 }
 0xe8e   :  { %v3818_v23 = vpop.eup %3817 }
 0xe8f   :  { %v3820_v24 = vpop.eup %3819  ;;  %v1553_v25 = vadd.f32 1.0, %v3818_v23 }
 0xe90   :  { %v1649_v26 = vadd.f32 1.0, %v3820_v24 }
 0xe91   :  { %3821 = vrcp.f32 %v1553_v25 }
 0xe92   :  { %3823 = vrcp.f32 %v1649_v26 }
 0xe9b   :  { %v3822_v54 = vpop.eup %3821 }
 0xe9c   :  { %v3824_v27 = vpop.eup %3823  ;;  %v1567_v44 = vsub.f32 1.0, %v3822_v54  ;;  %v1573_v47 = vmul.f32 %v3822_v54, %v4235_v63 }
 0xe9d   :  { %v1663_v40 = vsub.f32 1.0, %v3824_v27  ;;  %v1669_v55 = vmul.f32 %v3824_v27, %v4240_v6 }
 0xef4   :  { %v1654_v28 = vpop.permute.xlu1 %1653  ;;  %v1558_v29 = vpop.permute.xlu0 %1557 }
 0xef5   :  { %v1656_v30 = vmul.f32 %v3824_v27, %v1654_v28  ;;  %v1560_v32 = vmul.f32 %v3822_v54, %v1558_v29 }
 0xef7   :  { %1658 = vrot.lane.b32.xlu1 %v1656_v30, %s3864_s21  ;;  %1562 = vrot.lane.b32.xlu0 %v1560_v32, %s3864_s21 }
 0xf69   :  { %v1659_v33 = vpop.permute.xlu1 %1658  ;;  %v1563_v34 = vpop.permute.xlu0 %1562 }
 0xf6a   :  { %v1661_v36 = vadd.f32 %v1659_v33, %v1645_v19  ;;  %v1565_v37 = vadd.f32 %v1563_v34, %v1549_v18 }
 0xf6c   :  { %3825 = vtanh.f32 %v1661_v36 }
 0xf6d   :  { %3827 = vtanh.f32 %v1565_v37 }
 0xf76   :  { %v3826_v38 = vpop.eup %3825 }
 0xf77   :  { %v3828_v39 = vpop.eup %3827  ;;  %1665 = vrot.lane.b32.xlu1 %v3826_v38, %s3865_s17 }
 0xf78   :  { %1569 = vrot.lane.b32.xlu0 %v3828_v39, %s3865_s17 }
 0xfe9   :  { %v1666_v43 = vpop.permute.xlu1 %1665 }
 0xfea   :  { %v1668_v45 = vmul.f32 %v1666_v43, %v1663_v40  ;;  %v1570_v46 = vpop.permute.xlu0 %1569 }
 0xfeb   :  { %v1572_v48 = vmul.f32 %v1570_v46, %v1567_v44 }
 0xfec   :  { %v4276_v49 = vadd.f32 %v1669_v55, %v1668_v45 }
 0xfed   :  { %v4278_v50 = vadd.f32 %v1573_v47, %v1572_v48 }
 0xfee   :  { %1747 = vrot.lane.b32.xlu1 %v4276_v49, %s3865_s17 }
 0xfef   :  { %1672 = vrot.lane.b32.xlu0 %v4278_v50, %s3865_s17 }
0x1060   :  { %v1748_v51 = vpop.permute.xlu1 %1747 }
0x1061   :  { %v1673_v52 = vpop.permute.xlu0 %1672  ;;  %3376 = vmatmul.mubr.msk.f32.vlgmr.msra.gmra.mrb[18].mxu1 %vm216_vm2, %v1748_v51 }
0x1062   :  { %3365 = vmatmul.mubr.msk.f32.vlgmr.msra.gmra.mrb[22].mxu0 %vm216_vm2, %v1673_v52  ;;  %3666 = vmatpush3.bf16.msra.mxu1 %v4017_v35 }
0x1063   :  { %3660 = vmatpush3.bf16.msra.mxu0 %v3964_v8  ;;  %3386 = vmatprep.mubr.msk.f32.mxu0 %vm3861_vm1, %v3862_v4 }
0x1064   :  { %3661 = vmatprep.subr.bf16.mxu0 %v3860_v0  ;;  %3667 = vmatprep.subr.bf16.mxu1 %v3860_v0 }
0x1065   :  { %3397 = vmatprep.mubr.msk.f32.mxu1 %vm3861_vm1, %v3862_v4 }
0x1066   :  { %3669 = vmatpush3.bf16.msra.mxu1 %v4038_v41 }
0x1067   :  { %3663 = vmatpush3.bf16.msra.mxu0 %v3977_v12  ;;  %3676 = vmatprep.subr.bf16.mxu1 %v3860_v0 }
0x1068   :  { %3670 = vmatprep.subr.bf16.mxu0 %v3860_v0 }
0x106a   :  { %3387 = vmatmul.mubr.msk.f32.vlgmr.msra.gmra.mrb[24].mxu0 %vm216_vm2, %v1748_v51 }
0x106b   :  { %3672 = vmatpush3.bf16.msra.mxu0 %v4006_v31  ;;  %3408 = vmatprep.mubr.msk.f32.mxu0 %vm3861_vm1, %v3862_v4 }
0x106c   :  { %3673 = vmatprep.subr.bf16.mxu0 %v3860_v0 }
0x106f   :  { %3675 = vmatpush3.bf16.msra.mxu0 %v4040_v42 }
0x1070   :  { %3682 = vmatprep.subr.bf16.mxu0 %v3860_v0 }
0x1134   :  { %v1817_v56 = vpop.f32.mrb[18].mxu1 }
0x1135   :  { %v1742_v58 = vpop.f32.mrb[22].mxu0  ;;  %v3377_v60 = vpop.f32.mrb[19].mxu1 }
0x1136   :  { %v1818_v61 = vadd.f32 %v1817_v56, %v1742_v58  ;;  %v3366_v63 = vpop.f32.mrb[23].mxu0 }
0x1138   :  { %v1821_v1 = vadd.f32 %v4106_v62, %v1818_v61 }
0x113a   :  { %1829 = vrot.lane.b32.xlu0 %v1821_v1, %s3863_s20  ;;  %v2965_v7 = vmul.f32 -1.442695, %v1821_v1 }
0x113c   :  { %3829 = vpow2.f32 %v2965_v7 }
0x113d   :  { %v1913_v3 = vpop.f32.mrb[24].mxu0 }
0x113e   :  { %v1917_v5 = vadd.f32 %v1913_v3, %v208_v2  ;;  %v3388_v6 = vpop.f32.mrb[25].mxu0 }
0x1140   :  { %1925 = vrot.lane.b32.xlu1 %v1917_v5, %s3863_s20  ;;  %v2967_v9 = vmul.f32 -1.442695, %v1917_v5 }
0x1142   :  { %3831 = vpow2.f32 %v2967_v9 }
0x1146   :  { %v3830_v53 = vpop.eup %3829 }
0x1147   :  { %v1825_v10 = vadd.f32 1.0, %v3830_v53 }
0x1149   :  { %3833 = vrcp.f32 %v1825_v10 }
0x114c   :  { %v3832_v11 = vpop.eup %3831 }
0x114d   :  { %v1921_v14 = vadd.f32 1.0, %v3832_v11 }
0x114f   :  { %3835 = vrcp.f32 %v1921_v14 }
0x1153   :  { %v3834_v15 = vpop.eup %3833 }
0x1154   :  { %v1839_v25 = vsub.f32 1.0, %v3834_v15  ;;  %v1845_v54 = vmul.f32 %v3834_v15, %v4278_v50 }
0x1159   :  { %v3836_v13 = vpop.eup %3835 }
0x115a   :  { %v1935_v29 = vsub.f32 1.0, %v3836_v13  ;;  %v1941_v32 = vmul.f32 %v3836_v13, %v4276_v49 }
0x11ac   :  { %v1830_v16 = vpop.permute.xlu0 %1829 }
0x11ad   :  { %v1832_v17 = vmul.f32 %v3834_v15, %v1830_v16 }
0x11af   :  { %1834 = vrot.lane.b32.xlu0 %v1832_v17, %s3864_s21 }
0x11b2   :  { %v1926_v59 = vpop.permute.xlu1 %1925 }
0x11b3   :  { %v1928_v18 = vmul.f32 %v3836_v13, %v1926_v59 }
0x11b5   :  { %1930 = vrot.lane.b32.xlu1 %v1928_v18, %s3864_s21 }
0x1221   :  { %v1835_v19 = vpop.permute.xlu0 %1834 }
0x1222   :  { %v1837_v20 = vadd.f32 %v1835_v19, %v1821_v1 }
0x1224   :  { %3837 = vtanh.f32 %v1837_v20 }
0x1227   :  { %v1931_v21 = vpop.permute.xlu1 %1930 }
0x1228   :  { %v1933_v22 = vadd.f32 %v1931_v21, %v1917_v5 }
0x122a   :  { %3839 = vtanh.f32 %v1933_v22 }
0x122e   :  { %v3838_v23 = vpop.eup %3837 }
0x122f   :  { %1841 = vrot.lane.b32.xlu0 %v3838_v23, %s3865_s17 }
0x1234   :  { %v3840_v24 = vpop.eup %3839 }
0x1235   :  { %1937 = vrot.lane.b32.xlu1 %v3840_v24, %s3865_s17 }
0x12a1   :  { %v1842_v26 = vpop.permute.xlu0 %1841 }
0x12a2   :  { %v1844_v27 = vmul.f32 %v1842_v26, %v1839_v25 }
0x12a4   :  { %v4315_v28 = vadd.f32 %v1845_v54, %v1844_v27 }
0x12a6   :  { %1944 = vrot.lane.b32.xlu0 %v4315_v28, %s3865_s17 }
0x12a7   :  { %v1938_v30 = vpop.permute.xlu1 %1937 }
0x12a8   :  { %v1940_v33 = vmul.f32 %v1938_v30, %v1935_v29  ;;  %v2395_v30 = vld [vmem:[%s4561_s5 + $0x20] sm:$0xff] }
0x12aa   :  { %v4320_v34 = vadd.f32 %v1941_v32, %v1940_v33  ;;  %v2397_v32 = vld [vmem:[%s4561_s5 + $0x30] sm:$0xff] }
0x12ac   :  { %2019 = vrot.lane.b32.xlu1 %v4320_v34, %s3865_s17 }
0x1318   :  { %v1945_v36 = vpop.permute.xlu0 %1944 }
0x1319   :  { %3398 = vmatmul.mubr.msk.f32.vlgmr.msra.gmra.mrb[20].mxu1 %vm216_vm2, %v1945_v36  ;;  %v2391_v36 = vld [vmem:[%s4561_s5] sm:$0xff] }
0x131a   :  { %3678 = vmatpush3.bf16.msra.mxu1 %v3964_v8  ;;  %3419 = vmatprep.mubr.msk.f32.mxu1 %vm3861_vm1, %v3862_v4 }
0x131b   :  { %3679 = vmatprep.subr.bf16.mxu1 %v3860_v0 }
0x131e   :  { %3681 = vmatpush3.bf16.msra.mxu1 %v3977_v12  ;;  %v2020_v37 = vpop.permute.xlu1 %2019 }
0x131f   :  { %3409 = vmatmul.mubr.msk.f32.vlgmr.msra.gmra.mrb[26].mxu0 %vm216_vm2, %v2020_v37  ;;  %3688 = vmatprep.subr.bf16.mxu1 %v3860_v0 }
0x1320   :  { %3684 = vmatpush3.bf16.msra.mxu0 %v4017_v35  ;;  %3430 = vmatprep.mubr.msk.f32.mxu0 %vm3861_vm1, %v3862_v4 }
0x1321   :  { %3420 = vmatmul.mubr.msk.f32.vlgmr.msra.gmra.mrb[22].mxu1 %vm216_vm2, %v2020_v37  ;;  %3685 = vmatprep.subr.bf16.mxu0 %v3860_v0  ;;  %v2392_v37 = vld [vmem:[%s4561_s5 + $0x8] sm:$0xff] }
0x1322   :  { %3690 = vmatpush3.bf16.msra.mxu1 %v4006_v31  ;;  %3441 = vmatprep.mubr.msk.f32.mxu1 %vm3861_vm1, %v3862_v4  ;;  %v3859_v31 = vld [vmem:[%s4560_s4] ss:$0 sm:$0xff] }
0x1323   :  { %3691 = vmatprep.subr.bf16.mxu1 %v3860_v0  ;;  %v213_v38 = vadd.f32 %v3859_v31, %v4083_v57  ;;  %v2394_v31 = vld [vmem:[%s4561_s5 + $0x18] sm:$0xff] }
0x1324   :  { %3687 = vmatpush3.bf16.msra.mxu0 %v4038_v41 }
0x1325   :  { %3694 = vmatprep.subr.bf16.mxu0 %v3860_v0 }
0x1326   :  { %3693 = vmatpush3.bf16.msra.mxu1 %v4040_v42 }
0x1327   :  { %3706 = vmatprep.subr.bf16.mxu1 %v3860_v0 }
0x13ec   :  { %v2014_v8 = vpop.f32.mrb[20].mxu1 }
0x13ed   :  { %v3399_v12 = vpop.f32.mrb[21].mxu1 }
0x13ee   :  { %v3707_v12 = vpack.c.bf16 %v2392_v37, %v2391_v36 }
0x13f2   :  { %v2089_v35 = vpop.f32.mrb[26].mxu0 }
0x13f3   :  { %v2090_v39 = vadd.f32 %v2089_v35, %v2014_v8  ;;  %v3410_v40 = vpop.f32.mrb[27].mxu0  ;;  %v2393_v35 = vld [vmem:[%s4561_s5 + $0x10] sm:$0xff] }
0x13f4   :  { %v2185_v43 = vpop.f32.mrb[22].mxu1  ;;  %v2400_v40 = vld [vmem:[%s4561_s5 + $0x48] sm:$0xff] }
0x13f5   :  { %v2093_v41 = vadd.f32 %v4106_v62, %v2090_v39  ;;  %v2189_v44 = vadd.f32 %v2185_v43, %v213_v38  ;;  %v3421_v55 = vpop.f32.mrb[23].mxu1  ;;  %v2399_v39 = vld [vmem:[%s4561_s5 + $0x40] sm:$0xff]  ;;  %v3710_v43 = vpack.c.bf16 %v2394_v31, %v2393_v35  ;;  %v2670_v35 = vld [vmem:[%s4564_s9 + $0x38] sm:$0xff] }
0x13f6   :  { %v2402_v55 = vld [vmem:[%s4561_s5 + $0x58] sm:$0xff] }
0x13f7   :  { %2197 = vrot.lane.b32.xlu1 %v2189_v44, %s3863_s20  ;;  %2101 = vrot.lane.b32.xlu0 %v2093_v41, %s3863_s20  ;;  %v2970_v42 = vmul.f32 -1.442695, %v2093_v41  ;;  %v2972_v45 = vmul.f32 -1.442695, %v2189_v44 }
0x13f9   :  { %3841 = vpow2.f32 %v2970_v42 }
0x13fa   :  { %3843 = vpow2.f32 %v2972_v45  ;;  %v2406_v45 = vld [vmem:[%s4562_s1] sm:$0xff] }
0x1403   :  { %v3842_v46 = vpop.eup %3841 }
0x1404   :  { %v3844_v47 = vpop.eup %3843  ;;  %v2097_v48 = vadd.f32 1.0, %v3842_v46 }
0x1405   :  { %v2193_v49 = vadd.f32 1.0, %v3844_v47 }
0x1406   :  { %3845 = vrcp.f32 %v2097_v48 }
0x1407   :  { %3847 = vrcp.f32 %v2193_v49 }
0x1410   :  { %v3846_v57 = vpop.eup %3845 }
0x1411   :  { %v3848_v50 = vpop.eup %3847  ;;  %v2111_v7 = vsub.f32 1.0, %v3846_v57  ;;  %v2117_v11 = vmul.f32 %v3846_v57, %v4315_v28 }
0x1412   :  { %v2207_v5 = vsub.f32 1.0, %v3848_v50  ;;  %v2213_v9 = vmul.f32 %v3848_v50, %v4320_v34  ;;  %v2398_v34 = vld [vmem:[%s4561_s5 + $0x38] sm:$0xff] }
0x1413   :  { %v3698_v8 = vpack.c.bf16 %v2398_v34, %v2397_v32  ;;  %v2978_v32 = vld [vmem:[%s4565_s6] ss:$0 sm:$0xff] }
0x1469   :  { %v2198_v51 = vpop.permute.xlu1 %2197  ;;  %v2102_v52 = vpop.permute.xlu0 %2101 }
0x146a   :  { %v2200_v56 = vmul.f32 %v3848_v50, %v2198_v51  ;;  %v2104_v58 = vmul.f32 %v3846_v57, %v2102_v52 }
0x146c   :  { %2202 = vrot.lane.b32.xlu1 %v2200_v56, %s3864_s21  ;;  %2106 = vrot.lane.b32.xlu0 %v2104_v58, %s3864_s21  ;;  %v2567_v58 = vld [vmem:[%s4563_s7] sm:$0xff] }
0x14de   :  { %v2203_v60 = vpop.permute.xlu1 %2202  ;;  %v2107_v61 = vpop.permute.xlu0 %2106 }
0x14df   :  { %v2205_v63 = vadd.f32 %v2203_v60, %v2189_v44  ;;  %v2109_v1 = vadd.f32 %v2107_v61, %v2093_v41  ;;  %v3701_v41 = vpack.c.bf16 %v2400_v40, %v2399_v39  ;;  %v2401_v44 = vld [vmem:[%s4561_s5 + $0x50] sm:$0xff]  ;;  %v2568_v60 = vld [vmem:[%s4563_s7 + $0x8] sm:$0xff]  ;;  %v2754_v40 = vld [vmem:[%s4567_s11] sm:$0xff] }
0x14e0   :  { %v3704_v42 = vpack.c.bf16 %v2402_v55, %v2401_v44  ;;  %v3713_v61 = vpack.c.bf16 %v2568_v60, %v2567_v58  ;;  %v2841_v58 = vld [vmem:[%s4569_s13] sm:$0xff] }
0x14e1   :  { %3849 = vtanh.f32 %v2205_v63  ;;  %v2569_v63 = vld [vmem:[%s4563_s7 + $0x10] sm:$0xff] }
0x14e2   :  { %3851 = vtanh.f32 %v2109_v1  ;;  %v2570_v1 = vld [vmem:[%s4563_s7 + $0x18] sm:$0xff] }
0x14eb   :  { %v3850_v2 = vpop.eup %3849 }
0x14ec   :  { %v3852_v3 = vpop.eup %3851  ;;  %2209 = vrot.lane.b32.xlu1 %v3850_v2, %s3865_s17 }
0x14ed   :  { %2113 = vrot.lane.b32.xlu0 %v3852_v3, %s3865_s17  ;;  %v3716_v3 = vpack.c.bf16 %v2570_v1, %v2569_v63 }
0x155e   :  { %v2210_v6 = vpop.permute.xlu1 %2209 }
0x155f   :  { %v2212_v53 = vmul.f32 %v2210_v6, %v2207_v5  ;;  %v2114_v10 = vpop.permute.xlu0 %2113  ;;  %v2571_v5 = vld [vmem:[%s4563_s7 + $0x20] sm:$0xff]  ;;  %v2572_v6 = vld [vmem:[%s4563_s7 + $0x28] sm:$0xff] }
0x1560   :  { %v2116_v14 = vmul.f32 %v2114_v10, %v2111_v7  ;;  %v3719_v7 = vpack.c.bf16 %v2572_v6, %v2571_v5  ;;  %v2984_v5 = vld [vmem:[%s4571_s14] ss:$0 sm:$0xff] }
0x1561   :  { %v2214_v15 = vadd.f32 %v2213_v9, %v2212_v53  ;;  %v2573_v9 = vld [vmem:[%s4563_s7 + $0x30] sm:$0xff]  ;;  %v2574_v53 = vld [vmem:[%s4563_s7 + $0x38] sm:$0xff] }
0x1562   :  { %v4358_v16 = vadd.f32 %v2117_v11, %v2116_v14  ;;  %v3722_v10 = vpack.c.bf16 %v2574_v53, %v2573_v9  ;;  %v2575_v11 = vld [vmem:[%s4563_s7 + $0x40] sm:$0xff]  ;;  %v2576_v14 = vld [vmem:[%s4563_s7 + $0x48] sm:$0xff] }
0x1563   :  { %2291 = vrot.lane.b32.xlu1 %v2214_v15, %s3865_s17  ;;  %v3725_v15 = vpack.c.bf16 %v2576_v14, %v2575_v11 }
0x1564   :  { %2216 = vrot.lane.b32.xlu0 %v4358_v16, %s3865_s17 }
0x15d5   :  { %v2292_v17 = vpop.permute.xlu1 %2291 }
0x15d6   :  { %v2217_v13 = vpop.permute.xlu0 %2216  ;;  %3442 = vmatmul.mubr.msk.f32.vlgmr.msra.gmra.mrb[24].mxu1 %vm216_vm2, %v2292_v17  ;;  %v2578_v17 = vld [vmem:[%s4563_s7 + $0x58] sm:$0xff] }
0x15d7   :  { %3431 = vmatmul.mubr.msk.f32.vlgmr.msra.gmra.mrb[28].mxu0 %vm216_vm2, %v2217_v13  ;;  %3471 = vmatprep.mubr.msk.f32.mxu1 %vm3861_vm1, %v3862_v4 }
0x15d8   :  { %3460 = vmatprep.mubr.msk.f32.mxu0 %vm3861_vm1, %v3862_v4  ;;  %3708 = vmatpush3.bf16.msra.mxu1 %v3707_v12  ;;  %v2669_v12 = vld [vmem:[%s4564_s9 + $0x30] sm:$0xff] }
0x15d9   :  { %3709 = vmatprep.subr.bf16.mxu1 %v3860_v0  ;;  %v3746_v31 = vpack.c.bf16 %v2670_v35, %v2669_v12 }
0x15dc   :  { %3711 = vmatpush3.bf16.msra.mxu1 %v3710_v43  ;;  %v2755_v43 = vld [vmem:[%s4567_s11 + $0x8] sm:$0xff] }
0x15dd   :  { %3712 = vmatprep.subr.bf16.mxu1 %v3860_v0 }
0x16a9   :  { %v2361_v59 = vpop.f32.mrb[24].mxu1 }
0x16aa   :  { %v2286_v18 = vpop.f32.mrb[28].mxu0  ;;  %v3443_v19 = vpop.f32.mrb[25].mxu1 }
0x16ab   :  { %v2362_v20 = vadd.f32 %v2361_v59, %v2286_v18  ;;  %v3432_v21 = vpop.f32.mrb[29].mxu0  ;;  %v2579_v59 = vld [vmem:[%s4563_s7 + $0x60] sm:$0xff]  ;;  %v2580_v18 = vld [vmem:[%s4563_s7 + $0x68] sm:$0xff] }
0x16ac   :  { %v3731_v19 = vpack.c.bf16 %v2580_v18, %v2579_v59  ;;  %v2582_v21 = vld [vmem:[%s4563_s7 + $0x78] sm:$0xff] }
0x16ad   :  { %v2365_v22 = vadd.f32 %v4106_v62, %v2362_v20  ;;  %v2396_v62 = vld [vmem:[%s4561_s5 + $0x28] sm:$0xff]  ;;  %v2581_v20 = vld [vmem:[%s4563_s7 + $0x70] sm:$0xff] }
0x16ae   :  { %v3695_v33 = vpack.c.bf16 %v2396_v62, %v2395_v30 }
0x16af   :  { %2373 = vrot.lane.b32.xlu0 %v2365_v22, %s3863_s20  ;;  %v2975_v23 = vmul.f32 -1.442695, %v2365_v22 }
0x16b0   :  { %3696 = vmatpush3.bf16.msra.mxu0 %v3695_v33 }
0x16b1   :  { %3853 = vpow2.f32 %v2975_v23  ;;  %3697 = vmatprep.subr.bf16.mxu0 %v3860_v0  ;;  %v2663_v23 = vld [vmem:[%s4564_s9] sm:$0xff] }
0x16b4   :  { %3699 = vmatpush3.bf16.msra.mxu0 %v3698_v8 }
0x16b5   :  { %3700 = vmatprep.subr.bf16.mxu0 %v3860_v0 }
0x16b8   :  { %3702 = vmatpush3.bf16.msra.mxu0 %v3701_v41 }
0x16b9   :  { %3703 = vmatprep.subr.bf16.mxu0 %v3860_v0 }
0x16bb   :  { %v3854_v24 = vpop.eup %3853 }
0x16bc   :  { %v2369_v25 = vadd.f32 1.0, %v3854_v24  ;;  %3705 = vmatpush3.bf16.msra.mxu0 %v3704_v42  ;;  %v2664_v24 = vld [vmem:[%s4564_s9 + $0x8] sm:$0xff]  ;;  %v3749_v42 = vpack.c.bf16 %v2755_v43, %v2754_v40 }
0x16bd   :  { %3736 = vmatprep.subr.bf16.mxu0 %v3860_v0 }
0x16be   :  { %3855 = vrcp.f32 %v2369_v25  ;;  %v2665_v25 = vld [vmem:[%s4564_s9 + $0x10] sm:$0xff] }
0x16bf   :  { %3461 = vmatmul.mubr.msk.f32.vlgmr.msra.gmra.mrb[30].mxu0 %vm2407_vm3, %v2406_v45 }
0x16c0   :  { %3525 = vmatprep.mubr.msk.f32.mxu0 %vm3861_vm1, %v3862_v4 }
0x16c8   :  { %v3856_v26 = vpop.eup %3855 }
0x16c9   :  { %v2383_v46 = vsub.f32 1.0, %v3856_v26  ;;  %v2389_v48 = vmul.f32 %v3856_v26, %v4358_v16  ;;  %v2577_v16 = vld [vmem:[%s4563_s7 + $0x50] sm:$0xff] }
0x16ca   :  { %v3728_v13 = vpack.c.bf16 %v2578_v17, %v2577_v16 }
0x1721   :  { %v2374_v54 = vpop.permute.xlu0 %2373 }
0x1722   :  { %v2376_v27 = vmul.f32 %v3856_v26, %v2374_v54  ;;  %v3737_v26 = vpack.c.bf16 %v2664_v24, %v2663_v23  ;;  %v2666_v54 = vld [vmem:[%s4564_s9 + $0x18] sm:$0xff] }
0x1724   :  { %2378 = vrot.lane.b32.xlu1 %v2376_v27, %s3864_s21  ;;  %3738 = vmatpush3.bf16.msra.mxu0 %v3737_v26  ;;  %v3740_v27 = vpack.c.bf16 %v2666_v54, %v2665_v25 }
0x1725   :  { %3739 = vmatprep.subr.bf16.mxu0 %v3860_v0 }
0x1728   :  { %3741 = vmatpush3.bf16.msra.mxu0 %v3740_v27 }
0x1729   :  { %3742 = vmatprep.subr.bf16.mxu0 %v3860_v0 }
0x1792   :  { %v4423_v52 = vpop.f32.mrb[30].mxu0 }
0x1793   :  { %v3462_v56 = vpop.f32.mrb[31].mxu0 }
0x1796   :  { %v2379_v28 = vpop.permute.xlu1 %2378 }
0x1797   :  { %v2381_v29 = vadd.f32 %v2379_v28, %v2365_v22  ;;  %v3734_v22 = vpack.c.bf16 %v2582_v21, %v2581_v20  ;;  %v2667_v28 = vld [vmem:[%s4564_s9 + $0x20] sm:$0xff] }
0x1799   :  { %3857 = vtanh.f32 %v2381_v29  ;;  %v2668_v29 = vld [vmem:[%s4564_s9 + $0x28] sm:$0xff] }
0x179a   :  { %v3743_v30 = vpack.c.bf16 %v2668_v29, %v2667_v28 }
0x179c   :  { %3744 = vmatpush3.bf16.msra.mxu0 %v3743_v30 }
0x179d   :  { %3745 = vmatprep.subr.bf16.mxu0 %v3860_v0 }
0x17a0   :  { %3747 = vmatpush3.bf16.msra.mxu0 %v3746_v31 }
0x17a1   :  { %3748 = vmatprep.subr.bf16.mxu0 %v3860_v0 }
0x17a3   :  { %v3858_v38 = vpop.eup %3857 }
0x17a4   :  { %2385 = vrot.lane.b32.xlu0 %v3858_v38, %s3865_s17  ;;  %v2979_v38 = vld [vmem:[%s4566_s8] ss:$0 sm:$0xff] }
0x1816   :  { %v2386_v47 = vpop.permute.xlu0 %2385 }
0x1817   :  { %v2388_v49 = vmul.f32 %v2386_v47, %v2383_v46  ;;  %v2756_v46 = vld [vmem:[%s4567_s11 + $0x10] sm:$0xff]  ;;  %v2757_v47 = vld [vmem:[%s4567_s11 + $0x18] sm:$0xff] }
0x1819   :  { %v2390_v57 = vadd.f32 %v2389_v48, %v2388_v49  ;;  %v3752_v48 = vpack.c.bf16 %v2757_v47, %v2756_v46  ;;  %v2980_v49 = vld [vmem:[%s4568_s10] ss:$0 sm:$0xff] }
0x181b   :  { %vm2403_vm4 = vcmp.gt.f32.partialorder %v2390_v57, 0.0  ;;  %v2404_v50 = vmul.f32 0.01, %v2390_v57 }
0x181d   :  { %v2405_v51 = vsel %vm2403_vm4, %v2390_v57, %v2404_v50 }
0x181e   :  { %2482 = vrot.lane.b32.xlu1 %v2405_v51, %s3865_s17 }
0x1890   :  { %v2483_v2 = vpop.permute.xlu1 %2482 }
0x1891   :  { %3472 = vmatmul.mubr.msk.f32.vlgmr.msra.gmra.mrb[26].mxu1 %vm216_vm2, %v2483_v2 }
0x1892   :  { %3714 = vmatpush3.bf16.msra.mxu1 %v3713_v61  ;;  %3506 = vmatprep.mubr.msk.f32.mxu1 %vm3861_vm1, %v3862_v4  ;;  %v2982_v61 = vld [vmem:[%s4570_s12] ss:$0 sm:$0xff] }
0x1893   :  { %3715 = vmatprep.subr.bf16.mxu1 %v3860_v0 }
0x1896   :  { %3717 = vmatpush3.bf16.msra.mxu1 %v3716_v3 }
0x1897   :  { %3718 = vmatprep.subr.bf16.mxu1 %v3860_v0 }
0x189a   :  { %3720 = vmatpush3.bf16.msra.mxu1 %v3719_v7 }
0x189b   :  { %3721 = vmatprep.subr.bf16.mxu1 %v3860_v0 }
0x189e   :  { %3723 = vmatpush3.bf16.msra.mxu1 %v3722_v10 }
0x189f   :  { %3724 = vmatprep.subr.bf16.mxu1 %v3860_v0 }
0x18a2   :  { %3726 = vmatpush3.bf16.msra.mxu1 %v3725_v15 }
0x18a3   :  { %3727 = vmatprep.subr.bf16.mxu1 %v3860_v0 }
0x18a6   :  { %3729 = vmatpush3.bf16.msra.mxu1 %v3728_v13 }
0x18a7   :  { %3730 = vmatprep.subr.bf16.mxu1 %v3860_v0 }
0x18aa   :  { %3732 = vmatpush3.bf16.msra.mxu1 %v3731_v19 }
0x18ab   :  { %3733 = vmatprep.subr.bf16.mxu1 %v3860_v0 }
0x18ae   :  { %3735 = vmatpush3.bf16.msra.mxu1 %v3734_v22 }
0x1964   :  { %v2552_v62 = vpop.f32.mrb[26].mxu1 }
0x1965   :  { %v2553_v33 = vadd.f32 %v2552_v62, %v4423_v52  ;;  %v3473_v34 = vpop.f32.mrb[27].mxu1 }
0x1967   :  { %v2563_v36 = vadd.f32 %v2978_v32, %v2553_v33 }
0x1969   :  { %v2565_v37 = vmul.f32 0.01, %v2563_v36  ;;  %vm2564_vm5 = vcmp.gt.f32.partialorder %v2563_v36, 0.0 }
0x196b   :  { %v2566_v8 = vsel %vm2564_vm5, %v2563_v36, %v2565_v37 }
0x196c   :  { %3507 = vmatmul.mubr.f32.vlgmr.msra.gmra.mrb[28].mxu1 %v2566_v8 }
0x1a3f   :  { %v2656_v39 = vpop.f32.mrb[28].mxu1 }
0x1a40   :  { %v2657_v41 = vadd.f32 %v2979_v38, %v2656_v39  ;;  %v3508_v44 = vpop.f32.mrb[29].mxu1 }
0x1a42   :  { %vm2660_vm6 = vcmp.gt.f32.partialorder %v2657_v41, 0.0  ;;  %v2661_v55 = vmul.f32 0.01, %v2657_v41 }
0x1a44   :  { %v2662_v45 = vsel %vm2660_vm6, %v2657_v41, %v2661_v55 }
0x1a45   :  { %3526 = vmatmul.mubr.msk.f32.vlgmr.msra.gmra.mrb[32].mxu0 %vm2407_vm3, %v2662_v45 }
0x1a46   :  { %3750 = vmatpush3.bf16.msra.mxu0 %v3749_v42  ;;  %3536 = vmatprep.mubr.msk.f32.mxu0 %vm3861_vm1, %v3862_v4 }
0x1a47   :  { %3751 = vmatprep.subr.bf16.mxu0 %v3860_v0 }
0x1a4a   :  { %3753 = vmatpush3.bf16.msra.mxu0 %v3752_v48 }
0x1a4b   :  { %3754 = vmatprep.subr.bf16.mxu0 %v3860_v0  ;;  %v2842_v0 = vld [vmem:[%s4569_s13 + $0x8] sm:$0xff] }
0x1a4c   :  { %v3755_v60 = vpack.c.bf16 %v2842_v0, %v2841_v58 }
0x1b18   :  { %v2747_v57 = vpop.f32.mrb[32].mxu0 }
0x1b19   :  { %v2748_v50 = vadd.f32 %v2980_v49, %v2747_v57  ;;  %v3527_v51 = vpop.f32.mrb[33].mxu0 }
0x1b1b   :  { %vm2751_vm7 = vcmp.gt.f32.partialorder %v2748_v50, 0.0  ;;  %v2752_v52 = vmul.f32 0.01, %v2748_v50 }
0x1b1d   :  { %v2753_v56 = vsel %vm2751_vm7, %v2748_v50, %v2752_v52 }
0x1b1e   :  { %3537 = vmatmul.mubr.msk.f32.vlgmr.msra.gmra.mrb[34].mxu0 %vm216_vm2, %v2753_v56 }
0x1b1f   :  { %3543 = vmatprep.mubr.msk.f32.mxu0 %vm3861_vm1, %v3862_v4  ;;  %3756 = vmatpush3.bf16.msra.mxu0 %v3755_v60 }
0x1bf1   :  { %v2834_v63 = vpop.f32.mrb[34].mxu0 }
0x1bf2   :  { %v2835_v1 = vadd.f32 %v2982_v61, %v2834_v63  ;;  %v3538_v2 = vpop.f32.mrb[35].mxu0 }
0x1bf4   :  { %vm2838_vm8 = vcmp.gt.f32.partialorder %v2835_v1, 0.0  ;;  %v2839_v3 = vmul.f32 0.01, %v2835_v1 }
0x1bf6   :  { %v2840_v4 = vsel %vm2838_vm8, %v2835_v1, %v2839_v3 }
0x1bf7   :  { %3544 = vmatmul.mubr.msk.f32.vlgmr.msra.gmra.mrb[36].mxu0 %vm86_vm0, %v2840_v4 }
0x1cca   :  { %v2919_v6 = vpop.f32.mrb[36].mxu0 }
0x1ccb   :  { %v2920_v7 = vadd.f32 %v2984_v5, %v2919_v6  ;;  %v3545_v9 = vpop.f32.mrb[37].mxu0 }
0x1ccd   :  { %2923 = vst [vmem:[%s4572_s15] sm:$0xff] %v2920_v7 }

</bundles_post_ra>
